<compile_context>
chip_gen: v7x
topology: tpu7x:2x2x1
jax: 0.10.0
libtpu: 0.0.40
codegen_flags: <defaults>
</compile_context>

<pallas_src>
import jax
import jax.numpy as jnp
from jax.experimental import pallas as pl
from jax.experimental.pallas import tpu as pltpu

H = W = 224
KH = KW = 32            # CLIPVisualEncoder kernel_h / kernel_w / step
NPATCH_SIDE = 7
NPATCH = 49             # CLIPVisualEncoder num_patches
T = NPATCH + 1          # 50 tokens (CLS + 49 patches)
D = 128                 # reduced stand-in for the ViT-B/32 hidden dim (768)
L = 12                  # hooked transformer blocks
DIL = 11                # dilation kernel (torch.ones((1, 1, 11, 11)))
PAD = DIL // 2
EPS = 1e-8              # torch.cosine_similarity eps

CLIP_MEAN = jnp.array([0.48145466, 0.4578275, 0.40821073], jnp.float32).reshape(1, 3, 1, 1)
CLIP_STD = jnp.array([0.26862954, 0.26130258, 0.27577711], jnp.float32).reshape(1, 3, 1, 1)


# ----------------------------------------------------------------------------
# Kernel A (one-shot, __init__): fused mask preparation.
#   dilate (11x11 box conv, pad 5) -> clamp [0,1] -> invert ('for') -> 0.5
#   binarize -> per-32x32-patch zero fraction > 0.2 => drop patch.
# The dilation is two banded-ones matmuls (band @ m @ band) on the MXU, which
# reproduces zero padding exactly.  band / pool_t / pool are precomputed on the
# host (one-time) and fed in as bf16 inputs; all matmuls run bf16 on the MXU
# with f32 accumulation ({0,1} inputs and integer counts <= 121 are exact).
# ----------------------------------------------------------------------------
def _mask_prep_kernel(m_ref, band_ref, poolt_ref, pool_ref, out_ref):
    band = band_ref[...]                                            # (H, H) bf16
    dil = jnp.dot(band, m_ref[...], preferred_element_type=jnp.float32)      # rows
    dil = jnp.dot(dil.astype(jnp.bfloat16), band,
                  preferred_element_type=jnp.float32)               # cols
    dil = jnp.clip(dil, 0.0, 1.0)                                   # torch.clamp(conv2d, 0, 1)
    inv = 1.0 - dil                                                  # 'for' in loss_mask
    keep_map = jnp.where(inv < 0.5, 0.0, 1.0)                        # masks<0.5=0; >=0.5=1
    zeros = (1.0 - keep_map).astype(jnp.bfloat16)                    # (mask == 0) indicator

    # per-patch zero counts = pool_t @ zeros @ pool  (MXU; lane-dense (8,128) output)
    cnt = jnp.dot(poolt_ref[...], zeros, preferred_element_type=jnp.float32)   # (8, W)
    cnt = jnp.dot(cnt.astype(jnp.bfloat16), pool_ref[...],
                  preferred_element_type=jnp.float32)                           # (8, 128)
    frac = cnt * (1.0 / (KH * KW))
    out_ref[...] = jnp.where(frac > 0.2, 0.0, 1.0)                   # drop patch if >20% zero


def mask_prep(mask_hw):
    # One-time host-side constants (kept out of the kernel per perf review).
    idx = jnp.arange(H)
    band = (jnp.abs(idx[:, None] - idx[None, :]) <= PAD).astype(jnp.bfloat16)        # (H, H)
    pool_t = (idx[None, :] // KH == jnp.arange(8)[:, None]).astype(jnp.bfloat16)     # (8, H)
    pool = (jnp.arange(W)[:, None] // KW == jnp.arange(128)[None, :]).astype(jnp.bfloat16)  # (W, 128)

    keep_grid = pl.pallas_call(
        _mask_prep_kernel,
        out_shape=jax.ShapeDtypeStruct((8, 128), jnp.float32),
        grid=(1,),
        in_specs=[pl.BlockSpec((H, W), lambda i: (0, 0)),
                  pl.BlockSpec((H, H), lambda i: (0, 0)),
                  pl.BlockSpec((8, H), lambda i: (0, 0)),
                  pl.BlockSpec((W, 128), lambda i: (0, 0))],
        out_specs=pl.BlockSpec((8, 128), lambda i: (0, 0)),
        compiler_params=pltpu.CompilerParams(dimension_semantics=("arbitrary",)),
    )(mask_hw.astype(jnp.bfloat16), band, pool_t, pool)
    return keep_grid                                                  # (8,128); [:7,:7] = keep flags


# ----------------------------------------------------------------------------
# Kernel B (per forward): all L layer losses in ONE grid step.
#   loss[l] = mean_{b,t} (1 - cos(x[l]*m, y[l]*m))  with m the token keep mask.
# Since keep is {0,1} and constant over D, this equals 1 - sum_{b,t} keep[t]*cos
# / (B*T): masked tokens contribute exactly 1.0 (cos of zero vectors is 0 in
# torch's eps-clamped convention).  keep/(B*T) is folded into pk (built at init).
# ----------------------------------------------------------------------------
def _layer_cos_loss_kernel(x_ref, y_ref, pk_ref, o_ref):
    # bf16 HBM->VMEM DMA; single upcast to f32 right after load.
    x = x_ref[...].astype(jnp.float32)                              # (N, D), N = L*B*T
    y = y_ref[...].astype(jnp.float32)
    ones_col = jnp.ones((x.shape[-1], 1), jnp.float32)
    # D-axis reductions on the (otherwise idle) MXU; results stay as (N, 1)
    # columns so the token axis is never relaid out into lanes (no XLU pack).
    dot = jnp.dot(x * y, ones_col, preferred_element_type=jnp.float32)   # (N, 1)
    xx = jnp.dot(x * x, ones_col, preferred_element_type=jnp.float32)    # (N, 1)
    yy = jnp.dot(y * y, ones_col, preferred_element_type=jnp.float32)    # (N, 1)
    # cos = dot / max(||x||*||y||, eps) == dot * rsqrt(max(xx*yy, eps^2)); EUP rsqrt.
    cos = dot * jax.lax.rsqrt(jnp.maximum(xx * yy, EPS * EPS))           # (N, 1)
    # keep mask and 1/(B*T) are baked into pk; per-layer weighted sum on the MXU.
    wsum = jnp.dot(pk_ref[...], cos, preferred_element_type=jnp.float32)  # (L, 1)
    o_ref[...] = jnp.broadcast_to(1.0 - wsum, o_ref.shape)                # lane-dense (L, 128)


def masked_cos_layer_losses(x_feats, y_feats, pool_keep):
    Ln, B, Tn, Dn = x_feats.shape
    N = Ln * B * Tn
    x2 = x_feats.reshape(N, Dn).astype(jnp.bfloat16)   # B squeezed into the row axis
    y2 = y_feats.reshape(N, Dn).astype(jnp.bfloat16)
    # TODO(synk): at real ViT-B/32 sizes (D=768, B>1) replace grid=(1,) with L/B
    # tiling (grid=(L,) or (L, B//tb), dimension_semantics=('parallel', ...),
    # resident (L,128) accumulator, pl.Buffered(1) on the feature specs) so the
    # double-buffered block stays under v7x's 64 MiB VMEM; at this toy size the
    # collapsed single grid step is the right choice (per-step overhead dominates).
    out = pl.pallas_call(
        _layer_cos_loss_kernel,
        out_shape=jax.ShapeDtypeStruct((Ln, 128), jnp.float32),
        grid=(1,),
        in_specs=[pl.BlockSpec((N, Dn), lambda i: (0, 0)),
                  pl.BlockSpec((N, Dn), lambda i: (0, 0)),
                  pl.BlockSpec(pool_keep.shape, lambda i: (0, 0))],
        out_specs=pl.BlockSpec((Ln, 128), lambda i: (0, 0)),
        compiler_params=pltpu.CompilerParams(
            dimension_semantics=("arbitrary",),
            vmem_limit_bytes=32 * 1024 * 1024),
    )(x2, y2, pool_keep)
    return out[:, 0]                                                  # (L,)


# ----------------------------------------------------------------------------
# Glue: CLIP normalization + deterministic surrogate for the pretrained ViT.
# ----------------------------------------------------------------------------
def clip_normalize(x):
    return (x - CLIP_MEAN) / CLIP_STD


# TODO(synk): the pretrained CLIP ViT-B/32 (clip_model.encode_image + the 12 hooked
# resblocks) cannot be reproduced without checkpoint weights; a deterministic
# patch-projection surrogate produces the [L, B, T, D] featuremaps instead.
def surrogate_vit_features(img_nchw, key):
    B = img_nchw.shape[0]
    p = img_nchw.reshape(B, 3, NPATCH_SIDE, KH, NPATCH_SIDE, KW)
    p = p.transpose(0, 2, 4, 1, 3, 5).reshape(B, NPATCH, 3 * KH * KW)
    Wp = jax.random.normal(key, (3 * KH * KW, D), jnp.float32) * 0.02
    tok = p @ Wp                                              # (B, 49, D)
    cls = jnp.mean(tok, axis=1, keepdims=True)                # stand-in CLS token
    base = jnp.concatenate([cls, tok], axis=1)                # (B, 50, D)
    feats = jnp.stack([jnp.tanh(base * (0.5 + 0.1 * l)) for l in range(L)], axis=0)
    return feats.astype(jnp.bfloat16)      # features land in bf16 -> halves kernel-B HBM traffic


class CLIPConvLossPallas:
    """JAX/Pallas equivalent of CLIPConvLoss (ViT path, masked 'for' latent-mask
    variant, dilated mask, Cos conv loss, eval mode — no random augmentations)."""

    def __init__(self, mask_nchw, clip_conv_layer_weights, batch_size=1):
        self.clip_conv_layer_weights = clip_conv_layer_weights
        self.batch_size = batch_size
        # All mask processing is input-independent and runs ONCE here: dilation,
        # inversion, binarization and the per-patch keep flags are fused into a
        # single Pallas kernel (the 224x224 intermediate never leaves VMEM).
        mask_ch0 = mask_nchw[0, 0].astype(jnp.float32)            # (H, W)
        keep_grid = mask_prep(mask_ch0)                           # (8, 128)
        keep_row = jnp.concatenate(
            [jnp.ones((1,), jnp.float32),
             keep_grid[:NPATCH_SIDE, :NPATCH_SIDE].reshape(-1)])  # (50,), CLS always kept
        keep_bt = jnp.tile(keep_row, (batch_size,))               # (B*T,)
        # Per-layer reduction matrix consumed by kernel B: keep mask and the
        # 1/(B*T) mean are folded in here once, so per-forward there is no
        # separate keep input, broadcast, or masked (1,50) lane load.
        self.pool_keep = (jnp.kron(jnp.eye(L, dtype=jnp.float32), keep_bt[None, :])
                          * (1.0 / (batch_size * T)))             # (L, L*B*T)

    def forward(self, sketch, target):
        # TODO(synk): torchvision RandomPerspective / RandomResizedCrop train-time
        # augmentations are random image warps with no Pallas equivalent (eval mode).
        xs_back = clip_normalize(sketch)      # latent mask mode: pixels not masked
        ys_back = clip_normalize(target)

        # Pretrained CLIP encoder stub (same "model" applied to both inputs).
        feat_key = jax.random.PRNGKey(1)
        x_feats = surrogate_vit_features(xs_back, feat_key)       # (L, B, T, D) bf16
        y_feats = surrogate_vit_features(ys_back, feat_key)

        layer_losses = masked_cos_layer_losses(x_feats, y_feats, self.pool_keep)

        conv_loss_dict = {}
        for layer, w in enumerate(self.clip_conv_layer_weights):
            if w:
                conv_loss_dict[f'clip_vit_l{layer}'] = layer_losses[layer]
        # TODO(synk): fc-feature cosine loss (clip_fc_loss_weight) needs the CLIP
        # projection head weights; omitted here (weight 0).
        return conv_loss_dict


if __name__ == "__main__":
    key = jax.random.PRNGKey(0)
    k1, k2, k3 = jax.random.split(key, 3)
    sketch = jax.random.uniform(k1, (1, 3, H, W), jnp.float32)
    target = jax.random.uniform(k2, (1, 3, H, W), jnp.float32)
    mask1 = (jax.random.uniform(k3, (1, 1, H, W)) > 0.5).astype(jnp.float32)
    mask = jnp.concatenate([mask1, mask1, mask1], axis=1)     # [1, 3, H, W]

    weights = [0, 0, 1.0, 1.0, 0, 0, 0, 0, 0, 0, 0, 1.0]      # args.clip_conv_layer_weights
    loss_fn = CLIPConvLossPallas(mask, weights, batch_size=1)
    out = loss_fn.forward(sketch, target)
    out = {k: jax.block_until_ready(v) for k, v in out.items()}
    print("KERNEL_OK")
</pallas_src>

<mosaic_0001>
module attributes {stable_mosaic.version = 11 : i64} {
  func.func @_mask_prep_kernel(%arg0: i32, %arg1: memref<224x224xbf16, #tpu.memory_space<vmem>>, %arg2: memref<224x224xbf16, #tpu.memory_space<vmem>>, %arg3: memref<8x224xbf16, #tpu.memory_space<vmem>>, %arg4: memref<224x128xbf16, #tpu.memory_space<vmem>>, %arg5: memref<8x128xf32, #tpu.memory_space<vmem>>) attributes {dimension_semantics = [#tpu.dimension_semantics<arbitrary>], iteration_bounds = array<i64: 1>, scalar_prefetch = 0 : i64, scratch_operands = 0 : i64, tpu.core_type = #tpu.core_type<tc>, window_params = [{pipeline_mode = #tpu.pipeline_mode<synchronous>, transform_indices = @transform_0, window_bounds = array<i64: 224, 224>}, {pipeline_mode = #tpu.pipeline_mode<synchronous>, transform_indices = @transform_1, window_bounds = array<i64: 224, 224>}, {pipeline_mode = #tpu.pipeline_mode<synchronous>, transform_indices = @transform_2, window_bounds = array<i64: 8, 224>}, {pipeline_mode = #tpu.pipeline_mode<synchronous>, transform_indices = @transform_3, window_bounds = array<i64: 224, 128>}, {pipeline_mode = #tpu.pipeline_mode<synchronous>, transform_indices = @transform_4, window_bounds = array<i64: 8, 128>}]} {
    %c0 = arith.constant 0 : index
    %c0_0 = arith.constant 0 : index
    %0 = vector.load %arg2[%c0, %c0_0] : memref<224x224xbf16, #tpu.memory_space<vmem>>, vector<224x224xbf16>
    %c0_1 = arith.constant 0 : index
    %c0_2 = arith.constant 0 : index
    %1 = vector.load %arg1[%c0_1, %c0_2] : memref<224x224xbf16, #tpu.memory_space<vmem>>, vector<224x224xbf16>
    %cst = arith.constant dense<0.000000e+00> : vector<224x224xf32>
    %2 = tpu.matmul %0, %1, %cst {dimension_numbers = #tpu.dot_dimension_numbers<[1], [0], [0], [1], [0, 0, 1, 1], [], []>} : vector<224x224xbf16>, vector<224x224xbf16>, vector<224x224xf32> -> vector<224x224xf32>
    %3 = arith.truncf %2 : vector<224x224xf32> to vector<224x224xbf16>
    %cst_3 = arith.constant dense<0.000000e+00> : vector<224x224xf32>
    %4 = tpu.matmul %3, %0, %cst_3 {dimension_numbers = #tpu.dot_dimension_numbers<[1], [0], [0], [1], [0, 0, 1, 1], [], []>} : vector<224x224xbf16>, vector<224x224xbf16>, vector<224x224xf32> -> vector<224x224xf32>
    %cst_4 = arith.constant 0.000000e+00 : f32
    %cst_5 = arith.constant 1.000000e+00 : f32
    %5 = vector.broadcast %cst_4 : f32 to vector<224x224xf32>
    %6 = arith.maximumf %5, %4 : vector<224x224xf32>
    %7 = vector.broadcast %cst_5 : f32 to vector<224x224xf32>
    %8 = arith.minimumf %7, %6 : vector<224x224xf32>
    %cst_6 = arith.constant 1.000000e+00 : f32
    %9 = vector.broadcast %cst_6 : f32 to vector<224x224xf32>
    %10 = arith.subf %9, %8 : vector<224x224xf32>
    %cst_7 = arith.constant 5.000000e-01 : f32
    %11 = vector.broadcast %cst_7 : f32 to vector<224x224xf32>
    %12 = arith.cmpf olt, %10, %11 : vector<224x224xf32>
    %cst_8 = arith.constant 0.000000e+00 : f32
    %cst_9 = arith.constant 1.000000e+00 : f32
    %13 = vector.broadcast %cst_8 : f32 to vector<224x224xf32>
    %14 = vector.broadcast %cst_9 : f32 to vector<224x224xf32>
    %15 = arith.select %12, %13, %14 : vector<224x224xi1>, vector<224x224xf32>
    %cst_10 = arith.constant 1.000000e+00 : f32
    %16 = vector.broadcast %cst_10 : f32 to vector<224x224xf32>
    %17 = arith.subf %16, %15 : vector<224x224xf32>
    %18 = arith.truncf %17 : vector<224x224xf32> to vector<224x224xbf16>
    %c0_11 = arith.constant 0 : index
    %c0_12 = arith.constant 0 : index
    %19 = vector.load %arg3[%c0_11, %c0_12] : memref<8x224xbf16, #tpu.memory_space<vmem>>, vector<8x224xbf16>
    %cst_13 = arith.constant dense<0.000000e+00> : vector<8x224xf32>
    %20 = tpu.matmul %19, %18, %cst_13 {dimension_numbers = #tpu.dot_dimension_numbers<[1], [0], [0], [1], [0, 0, 1, 1], [], []>} : vector<8x224xbf16>, vector<224x224xbf16>, vector<8x224xf32> -> vector<8x224xf32>
    %21 = arith.truncf %20 : vector<8x224xf32> to vector<8x224xbf16>
    %c0_14 = arith.constant 0 : index
    %c0_15 = arith.constant 0 : index
    %22 = vector.load %arg4[%c0_14, %c0_15] : memref<224x128xbf16, #tpu.memory_space<vmem>>, vector<224x128xbf16>
    %cst_16 = arith.constant dense<0.000000e+00> : vector<8x128xf32>
    %23 = tpu.matmul %21, %22, %cst_16 {dimension_numbers = #tpu.dot_dimension_numbers<[1], [0], [0], [1], [0, 0, 1, 1], [], []>} : vector<8x224xbf16>, vector<224x128xbf16>, vector<8x128xf32> -> vector<8x128xf32>
    %cst_17 = arith.constant 9.765625E-4 : f32
    %24 = vector.broadcast %cst_17 : f32 to vector<8x128xf32>
    %25 = arith.mulf %23, %24 : vector<8x128xf32>
    %cst_18 = arith.constant 2.000000e-01 : f32
    %26 = vector.broadcast %cst_18 : f32 to vector<8x128xf32>
    %27 = arith.cmpf ogt, %25, %26 : vector<8x128xf32>
    %cst_19 = arith.constant 0.000000e+00 : f32
    %cst_20 = arith.constant 1.000000e+00 : f32
    %28 = vector.broadcast %cst_19 : f32 to vector<8x128xf32>
    %29 = vector.broadcast %cst_20 : f32 to vector<8x128xf32>
    %30 = arith.select %27, %28, %29 : vector<8x128xi1>, vector<8x128xf32>
    %c0_21 = arith.constant 0 : index
    %c0_22 = arith.constant 0 : index
    %31 = vector.load %arg5[%c0_21, %c0_22] : memref<8x128xf32, #tpu.memory_space<vmem>>, vector<8x128xf32>
    tpu.vector_store %arg5[%c0_21, %c0_22], %30 {strides = array<i32>} : memref<8x128xf32, #tpu.memory_space<vmem>>, vector<8x128xf32>,
    return
  }
  func.func @transform_0(%arg0: i32) -> (i32, i32) {
    %c0_i32 = arith.constant 0 : i32
    %c0_i32_0 = arith.constant 0 : i32
    %c0_i32_1 = arith.constant 0 : i32
    return %c0_i32, %c0_i32_0 : i32, i32
  }
  func.func @transform_1(%arg0: i32) -> (i32, i32) {
    %c0_i32 = arith.constant 0 : i32
    %c0_i32_0 = arith.constant 0 : i32
    %c0_i32_1 = arith.constant 0 : i32
    return %c0_i32, %c0_i32_0 : i32, i32
  }
  func.func @transform_2(%arg0: i32) -> (i32, i32) {
    %c0_i32 = arith.constant 0 : i32
    %c0_i32_0 = arith.constant 0 : i32
    %c0_i32_1 = arith.constant 0 : i32
    return %c0_i32, %c0_i32_0 : i32, i32
  }
  func.func @transform_3(%arg0: i32) -> (i32, i32) {
    %c0_i32 = arith.constant 0 : i32
    %c0_i32_0 = arith.constant 0 : i32
    %c0_i32_1 = arith.constant 0 : i32
    return %c0_i32, %c0_i32_0 : i32, i32
  }
  func.func @transform_4(%arg0: i32) -> (i32, i32) {
    %c0_i32 = arith.constant 0 : i32
    %c0_i32_0 = arith.constant 0 : i32
    %c0_i32_1 = arith.constant 0 : i32
    return %c0_i32, %c0_i32_0 : i32, i32
  }
}

</mosaic_0001>

<bundles_post_ra>
// kernel: tpu_custom_call.1
= control target key start
LH: loop header
LB: loop body
LE: loop exit
PB: predicated region body
PF: predicated region fallthrough
CT: control target
= control target key end

     0   :  { %9 = vsyncpa [#allocation3], 0  ;;  %s2040_s0 = inlined_call_operand.hbm [shape: bf16[224,224], index: 0, kind: input, shape index: {}]   ;;  %s2041_s1 = inlined_call_operand.hbm [shape: bf16[224,224], index: 1, kind: input, shape index: {}]   ;;  %s2042_s2 = inlined_call_operand.hbm [shape: bf16[8,224], index: 2, kind: input, shape index: {}]   ;;  %s2043_s3 = inlined_call_operand.hbm [shape: bf16[224,128], index: 3, kind: input, shape index: {}]   ;;  %s2044_s4 = inlined_call_operand.hbm [shape: f32[8,128], index: 4, kind: output, shape index: {}]  }
   0x1   :  { %10 = vsyncpa [#allocation6], 0 }
   0x2   :  { %11 = vsyncpa [#allocation9], 0 }
   0x3   :  { %12 = vsyncpa [#allocation4], 0  ;;  %s1791_s15 = smov [#allocation5]   ;;  %s1792_s17 = smov [#allocation2]  }
   0x4   :  { %s30_s16 = sshll.u32 %s1791_s15, 4  ;;  %s18_s18 = sshll.u32 %s1792_s17, 4  ;;  %s31_s16 = int_to_ptr.vmem [resolvable:$true] %s30_s16  ;;  %s1827_s18 = int_to_ptr.vmem [resolvable:$true] %s18_s18 }
   0x5   :  { %s1673_s21 = scalar_lea.hbm %s2041_s1, 3584 }
   0x6   :  { %p1674_p0 = scmp.ne.s32.totalorder %s2041_s1, %s1673_s21  ;;  %p1677_p1 = scmp.lt.u32.totalorder %s1673_s21, %s2041_s1 }
   0x8   :  { %p1679_p2 = pnand %p1677_p1, %p1674_p0 }
   0xa   :  { %1682 = shalt.err (!%p1679_p2)
}
   0xb   :  { %s1683_s26 = scalar_lea.vmem %s31_s16, 3584  ;;  %p1688_p4 = scmp.lt.s32.totalorder %s31_s16, %s31_s16 }
   0xc   :  { %p1684_p3 = scmp.ne.s32.totalorder %s31_s16, %s1683_s26  ;;  %p1689_p5 = scmp.lt.s32.totalorder %s1683_s26, %s1683_s26 }
   0xe   :  { %p1690_p6 = por %p1689_p5, %p1688_p4 }
  0x10   :  { %p1691_p7 = pnand %p1690_p6, %p1684_p3 }
  0x12   :  { %1694 = shalt.err (!%p1691_p7)
}
  0x13   :  { %s1793_s27 = smov 128   ;;  %s1794_s28 = smov 8  }
  0x14   :  { %36 = dma.hbm_to_vmem [thread:$0]  %s2041_s1, 3584, %s31_s16, [#allocation6], %s1793_s27, %s1793_s27, %s1794_s28  }
  0x15   :  { %s1695_s7 = scalar_lea.hbm %s2040_s0, 3584 }
  0x16   :  { %p1696_p8 = scmp.ne.s32.totalorder %s2040_s0, %s1695_s7  ;;  %p1699_p9 = scmp.lt.u32.totalorder %s1695_s7, %s2040_s0 }
  0x18   :  { %p1701_p10 = pnand %p1699_p9, %p1696_p8 }
  0x1a   :  { %1704 = shalt.err (!%p1701_p10)
}
  0x1b   :  { %s1705_s12 = scalar_lea.vmem %s1827_s18, 3584  ;;  %p1710_p12 = scmp.lt.s32.totalorder %s1827_s18, %s1827_s18 }
  0x1c   :  { %p1706_p11 = scmp.ne.s32.totalorder %s1827_s18, %s1705_s12  ;;  %p1711_p13 = scmp.lt.s32.totalorder %s1705_s12, %s1705_s12 }
  0x1e   :  { %p1712_p0 = por %p1711_p13, %p1710_p12 }
  0x20   :  { %p1713_p1 = pnand %p1712_p0, %p1706_p11 }
  0x22   :  { %1716 = shalt.err (!%p1713_p1)
}
  0x23   :  { %24 = dma.hbm_to_vmem [thread:$0]  %s2040_s0, 3584, %s1827_s18, [#allocation3], %s1793_s27, %s1793_s27, %s1794_s28  }
  0x24   :  { %s1795_s14 = smov [#allocation7]   ;;  %s1796_s16 = smov [#allocation8]  }
  0x25   :  { %s43_s15 = sshll.u32 %s1795_s14, 4  ;;  %s52_s17 = sshll.u32 %s1796_s16, 4  ;;  %s44_s15 = int_to_ptr.vmem [resolvable:$true] %s43_s15  ;;  %s1858_s17 = int_to_ptr.vmem [resolvable:$true] %s52_s17 }
  0x26   :  { %s1717_s21 = scalar_lea.hbm %s2042_s2, 128 }
  0x27   :  { %p1718_p2 = scmp.ne.s32.totalorder %s2042_s2, %s1717_s21  ;;  %p1721_p3 = scmp.lt.u32.totalorder %s1717_s21, %s2042_s2 }
  0x29   :  { %p1723_p4 = pnand %p1721_p3, %p1718_p2 }
  0x2b   :  { %1726 = shalt.err (!%p1723_p4)
}
  0x2c   :  { %s1727_s0 = scalar_lea.vmem %s44_s15, 128  ;;  %p1732_p6 = scmp.lt.s32.totalorder %s44_s15, %s44_s15 }
  0x2d   :  { %p1728_p5 = scmp.ne.s32.totalorder %s44_s15, %s1727_s0  ;;  %p1733_p7 = scmp.lt.s32.totalorder %s1727_s0, %s1727_s0 }
  0x2f   :  { %p1734_p8 = por %p1733_p7, %p1732_p6 }
  0x31   :  { %p1735_p9 = pnand %p1734_p8, %p1728_p5 }
  0x33   :  { %1738 = shalt.err (!%p1735_p9)
}
  0x34   :  { %46 = dma.hbm_to_vmem [thread:$0]  %s2042_s2, 128, %s44_s15, [#allocation6]  }
  0x35   :  { %s1739_s29 = scalar_lea.hbm %s2043_s3, 1792 }
  0x36   :  { %p1740_p10 = scmp.ne.s32.totalorder %s2043_s3, %s1739_s29  ;;  %p1743_p11 = scmp.lt.u32.totalorder %s1739_s29, %s2043_s3 }
  0x38   :  { %p1745_p12 = pnand %p1743_p11, %p1740_p10 }
  0x3a   :  { %1748 = shalt.err (!%p1745_p12)
}
  0x3b   :  { %s1749_s8 = scalar_lea.vmem %s1858_s17, 1792  ;;  %p1754_p0 = scmp.lt.s32.totalorder %s1858_s17, %s1858_s17 }
  0x3c   :  { %p1750_p13 = scmp.ne.s32.totalorder %s1858_s17, %s1749_s8  ;;  %p1755_p1 = scmp.lt.s32.totalorder %s1749_s8, %s1749_s8 }
  0x3e   :  { %p1756_p2 = por %p1755_p1, %p1754_p0 }
  0x40   :  { %p1757_p3 = pnand %p1756_p2, %p1750_p13 }
  0x42   :  { %1760 = shalt.err (!%p1757_p3)
}
  0x43   :  { %s1797_s2 = smov 64   ;;  %s1798_s9 = smov 4  }
  0x44   :  { %58 = dma.hbm_to_vmem [thread:$0]  %s2043_s3, 1792, %s1858_s17, [#allocation9], %s1797_s2, %s1797_s2, %s1798_s9  }
  0x45   :  { %1783 = dma.done.wait [#allocation3], 3584  }
  0x46   :  { %1784 = vsyncadd [#allocation3], 4294963712 }
  0x47   :  { %1785 = dma.done.wait [#allocation6], 3712  }
  0x48   :  { %1786 = vsyncadd [#allocation6], 4294963584 }
  0x49   :  { %1787 = dma.done.wait [#allocation9], 1792  }
  0x4a   :  { %1788 = vsyncadd [#allocation9], 4294965504  ;;  %v1573_v0 = vld [vmem:[#allocation2 + $0x4] ss:$8 sps:$4 sm:$0xff]   ;;  %v1575_v1 = vld [vmem:[#allocation2] ss:$8 sps:$4 sm:$0xff]  }
  0x4b   :  { %437 = vmatprep.subr.bf16.mxu0 %v1573_v0  ;;  %v1576_v2 = vld [vmem:[#allocation2 + $0x14] ss:$8 sps:$4 sm:$0xff]   ;;  %v1578_v3 = vld [vmem:[#allocation2 + $0x10] ss:$8 sps:$4 sm:$0xff]   ;;  %v1579_v4 = vld [vmem:[#allocation2 + $0x24] ss:$8 sps:$4 sm:$0xff]  }
  0x4c   :  { %438 = vmatpush1.bf16.msra.mxu0 %v1575_v1  ;;  %v1581_v5 = vld [vmem:[#allocation2 + $0x20] ss:$8 sps:$4 sm:$0xff]   ;;  %v1582_v6 = vld [vmem:[#allocation2 + $0x34] ss:$8 sps:$4 sm:$0xff]   ;;  %v1584_v7 = vld [vmem:[#allocation2 + $0x30] ss:$8 sps:$4 sm:$0xff]  }
  0x4d   :  { %439 = vmatprep.subr.bf16.mxu0 %v1576_v2  ;;  %v1585_v8 = vld [vmem:[#allocation2 + $0x44] ss:$8 sps:$4 sm:$0xff]   ;;  %v1587_v9 = vld [vmem:[#allocation2 + $0x40] ss:$8 sps:$4 sm:$0xff]   ;;  %v1588_v10 = vld [vmem:[#allocation2 + $0x54] ss:$8 sps:$4 sm:$0xff]  }
  0x4e   :  { %v1590_v11 = vld [vmem:[#allocation2 + $0x50] ss:$8 sps:$4 sm:$0xff]   ;;  %vm394_vm0 = vcmask 785408   ;;  %v1591_v12 = vld [vmem:[#allocation2 + $0x64] ss:$8 sps:$4 sm:$0xff]   ;;  %s1801_s3 = smov [#allocation10]  }
  0x4f   :  { %v1617_v13 = vld [vmem:[#allocation5 + $0x4] ss:$8 sps:$4 sm:$0xff]   ;;  %v1889_v14 = vld [vmem:[#allocation5] ss:$8 sps:$4 sm:$0xff]   ;;  %v1892_v15 = vld [vmem:[#allocation5 + $0x14] ss:$8 sps:$4 sm:$0xff]  }
  0x50   :  { %440 = vmatpush1.bf16.msra.mxu0 %v1578_v3  ;;  %1516 = vmatprep.mubr.msk.bf16.mxu0 %vm394_vm0, %v1617_v13  ;;  %v1593_v16 = vld [vmem:[#allocation2 + $0x60] ss:$8 sps:$4 sm:$0xff]   ;;  %v1594_v17 = vld [vmem:[#allocation2 + $0x74] ss:$8 sps:$4 sm:$0xff]   ;;  %v1896_v18 = vld [vmem:[#allocation5 + $0x10] ss:$8 sps:$4 sm:$0xff]  }
  0x51   :  { %441 = vmatprep.subr.bf16.mxu0 %v1579_v4  ;;  %694 = vmatprep.subr.bf16.mxu1 %v1617_v13  ;;  %v1898_v19 = vld [vmem:[#allocation5 + $0x24] ss:$8 sps:$4 sm:$0xff]   ;;  %v1596_v20 = vld [vmem:[#allocation2 + $0x70] ss:$8 sps:$4 sm:$0xff]   ;;  %v1902_v22 = vld [vmem:[#allocation5 + $0x20] ss:$8 sps:$4 sm:$0xff]  }
  0x52   :  { %695 = vmatpush1.bf16.msra.mxu1 %v1889_v14  ;;  %v1597_v21 = vld [vmem:[#allocation2 + $0x84] ss:$8 sps:$4 sm:$0xff]   ;;  %v1904_v23 = vld [vmem:[#allocation5 + $0x34] ss:$8 sps:$4 sm:$0xff]   ;;  %v1599_v24 = vld [vmem:[#allocation2 + $0x80] ss:$8 sps:$4 sm:$0xff]  }
  0x53   :  { %696 = vmatprep.subr.bf16.mxu1 %v1892_v15  ;;  %v1600_v25 = vld [vmem:[#allocation2 + $0x94] ss:$8 sps:$4 sm:$0xff]   ;;  %v1908_v26 = vld [vmem:[#allocation5 + $0x30] ss:$8 sps:$4 sm:$0xff]   ;;  %v1910_v27 = vld [vmem:[#allocation5 + $0x44] ss:$8 sps:$4 sm:$0xff]  }
  0x54   :  { %442 = vmatpush1.bf16.msra.mxu0 %v1581_v5  ;;  %v1602_v28 = vld [vmem:[#allocation2 + $0x90] ss:$8 sps:$4 sm:$0xff]   ;;  %v1603_v29 = vld [vmem:[#allocation2 + $0xa4] ss:$8 sps:$4 sm:$0xff]   ;;  %v1629_v30 = vld [vmem:[#allocation5 + $0x40] ss:$8 sps:$4 sm:$0xff]  }
  0x55   :  { %443 = vmatprep.subr.bf16.mxu0 %v1582_v6  ;;  %v1605_v31 = vld [vmem:[#allocation2 + $0xa0] ss:$8 sps:$4 sm:$0xff]   ;;  %v1630_v32 = vld [vmem:[#allocation5 + $0x54] ss:$8 sps:$4 sm:$0xff]   ;;  %v1632_v34 = vld [vmem:[#allocation5 + $0x50] ss:$8 sps:$4 sm:$0xff]  }
  0x56   :  { %697 = vmatpush1.bf16.msra.mxu1 %v1896_v18  ;;  %v1606_v33 = vld [vmem:[#allocation2 + $0xb4] ss:$8 sps:$4 sm:$0xff]   ;;  %v1633_v35 = vld [vmem:[#allocation5 + $0x64] ss:$8 sps:$4 sm:$0xff]   ;;  %v1608_v36 = vld [vmem:[#allocation2 + $0xb0] ss:$8 sps:$4 sm:$0xff]  }
  0x57   :  { %698 = vmatprep.subr.bf16.mxu1 %v1898_v19  ;;  %v1609_v37 = vld [vmem:[#allocation2 + $0xc4] ss:$8 sps:$4 sm:$0xff]   ;;  %v1635_v38 = vld [vmem:[#allocation5 + $0x60] ss:$8 sps:$4 sm:$0xff]   ;;  %v1636_v39 = vld [vmem:[#allocation5 + $0x74] ss:$8 sps:$4 sm:$0xff]  }
  0x58   :  { %444 = vmatpush1.bf16.msra.mxu0 %v1584_v7  ;;  %v1611_v40 = vld [vmem:[#allocation2 + $0xc0] ss:$8 sps:$4 sm:$0xff]   ;;  %v1612_v41 = vld [vmem:[#allocation2 + $0xd4] ss:$8 sps:$4 sm:$0xff]   ;;  %v1638_v42 = vld [vmem:[#allocation5 + $0x70] ss:$8 sps:$4 sm:$0xff]  }
  0x59   :  { %445 = vmatprep.subr.bf16.mxu0 %v1585_v8  ;;  %v1639_v43 = vld [vmem:[#allocation5 + $0x84] ss:$8 sps:$4 sm:$0xff]   ;;  %v1614_v44 = vld [vmem:[#allocation2 + $0xd0] ss:$8 sps:$4 sm:$0xff]   ;;  %v1641_v45 = vld [vmem:[#allocation5 + $0x80] ss:$8 sps:$4 sm:$0xff]  }
  0x5a   :  { %699 = vmatpush1.bf16.msra.mxu1 %v1902_v22  ;;  %v1642_v46 = vld [vmem:[#allocation5 + $0x94] ss:$8 sps:$4 sm:$0xff]   ;;  %v1644_v47 = vld [vmem:[#allocation5 + $0x90] ss:$8 sps:$4 sm:$0xff]   ;;  %v1645_v48 = vld [vmem:[#allocation5 + $0xa4] ss:$8 sps:$4 sm:$0xff]  }
  0x5b   :  { %700 = vmatprep.subr.bf16.mxu1 %v1904_v23  ;;  %v1647_v49 = vld [vmem:[#allocation5 + $0xa0] ss:$8 sps:$4 sm:$0xff]   ;;  %v1648_v50 = vld [vmem:[#allocation5 + $0xb4] ss:$8 sps:$4 sm:$0xff]   ;;  %v1650_v51 = vld [vmem:[#allocation5 + $0xb0] ss:$8 sps:$4 sm:$0xff]  }
  0x5c   :  { %446 = vmatpush1.bf16.msra.mxu0 %v1587_v9  ;;  %v1651_v52 = vld [vmem:[#allocation5 + $0xc4] ss:$8 sps:$4 sm:$0xff]   ;;  %v1653_v53 = vld [vmem:[#allocation5 + $0xc0] ss:$8 sps:$4 sm:$0xff]   ;;  %v1654_v54 = vld [vmem:[#allocation5 + $0xd4] ss:$8 sps:$4 sm:$0xff]  }
  0x5d   :  { %447 = vmatprep.subr.bf16.mxu0 %v1588_v10  ;;  %v1656_v55 = vld [vmem:[#allocation5 + $0xd0] ss:$8 sps:$4 sm:$0xff]   ;;  %s1449_s12 = sshll.u32 %s1801_s3, 4  ;;  %s1450_s12 = int_to_ptr.vmem [resolvable:$true] %s1449_s12 }
  0x5e   :  { %701 = vmatpush1.bf16.msra.mxu1 %v1908_v26  ;;  %s1761_s1 = scalar_lea.vmem %s1450_s12, 128  ;;  %p1766_p5 = scmp.lt.s32.totalorder %s1450_s12, %s1450_s12 }
  0x5f   :  { %702 = vmatprep.subr.bf16.mxu1 %v1910_v27  ;;  %p1762_p4 = scmp.ne.s32.totalorder %s1450_s12, %s1761_s1  ;;  %p1767_p6 = scmp.lt.s32.totalorder %s1761_s1, %s1761_s1 }
  0x60   :  { %448 = vmatpush1.bf16.msra.mxu0 %v1590_v11 }
  0x61   :  { %449 = vmatprep.subr.bf16.mxu0 %v1591_v12  ;;  %p1768_p7 = por %p1767_p6, %p1766_p5 }
  0x62   :  { %703 = vmatpush1.bf16.msra.mxu1 %v1629_v30 }
  0x63   :  { %704 = vmatprep.subr.bf16.mxu1 %v1630_v32  ;;  %p1769_p8 = pnand %p1768_p7, %p1762_p4 }
  0x64   :  { %450 = vmatpush1.bf16.msra.mxu0 %v1593_v16 }
  0x65   :  { %451 = vmatprep.subr.bf16.mxu0 %v1594_v17 }
  0x66   :  { %705 = vmatpush1.bf16.msra.mxu1 %v1632_v34 }
  0x67   :  { %706 = vmatprep.subr.bf16.mxu1 %v1633_v35 }
  0x68   :  { %452 = vmatpush1.bf16.msra.mxu0 %v1596_v20 }
  0x69   :  { %453 = vmatprep.subr.bf16.mxu0 %v1597_v21 }
  0x6a   :  { %707 = vmatpush1.bf16.msra.mxu1 %v1635_v38 }
  0x6b   :  { %708 = vmatprep.subr.bf16.mxu1 %v1636_v39 }
  0x6c   :  { %454 = vmatpush1.bf16.msra.mxu0 %v1599_v24 }
  0x6d   :  { %455 = vmatprep.subr.bf16.mxu0 %v1600_v25 }
  0x6e   :  { %709 = vmatpush1.bf16.msra.mxu1 %v1638_v42 }
  0x6f   :  { %710 = vmatprep.subr.bf16.mxu1 %v1639_v43 }
  0x70   :  { %456 = vmatpush1.bf16.msra.mxu0 %v1602_v28 }
  0x71   :  { %457 = vmatprep.subr.bf16.mxu0 %v1603_v29 }
  0x72   :  { %711 = vmatpush1.bf16.msra.mxu1 %v1641_v45 }
  0x73   :  { %712 = vmatprep.subr.bf16.mxu1 %v1642_v46 }
  0x74   :  { %458 = vmatpush1.bf16.msra.mxu0 %v1605_v31 }
  0x75   :  { %459 = vmatprep.subr.bf16.mxu0 %v1606_v33 }
  0x76   :  { %713 = vmatpush1.bf16.msra.mxu1 %v1644_v47 }
  0x77   :  { %714 = vmatprep.subr.bf16.mxu1 %v1645_v48 }
  0x78   :  { %460 = vmatpush1.bf16.msra.mxu0 %v1608_v36 }
  0x79   :  { %461 = vmatprep.subr.bf16.mxu0 %v1609_v37 }
  0x7a   :  { %715 = vmatpush1.bf16.msra.mxu1 %v1647_v49 }
  0x7b   :  { %716 = vmatprep.subr.bf16.mxu1 %v1648_v50 }
  0x7c   :  { %462 = vmatpush1.bf16.msra.mxu0 %v1611_v40 }
  0x7d   :  { %463 = vmatprep.subr.bf16.mxu0 %v1612_v41 }
  0x7e   :  { %717 = vmatpush1.bf16.msra.mxu1 %v1650_v51 }
  0x7f   :  { %718 = vmatprep.subr.bf16.mxu1 %v1651_v52 }
  0x80   :  { %464 = vmatpush1.bf16.msra.mxu0 %v1614_v44 }
  0x82   :  { %719 = vmatpush1.bf16.msra.mxu1 %v1653_v53 }
  0x83   :  { %470 = vmatmul.mubr.bf16.vlgmr.msra.gmra.mrb[0].mxu0 %v1889_v14  ;;  %720 = vmatprep.subr.bf16.mxu1 %v1654_v54 }
  0x84   :  { %1517 = vmatprep.mubr.msk.bf16.mxu0 %vm394_vm0, %v1892_v15 }
  0x86   :  { %721 = vmatpush1.bf16.msra.mxu1 %v1656_v55 }
  0x8b   :  { %480 = vmatmul.mubr.bf16.gmra.mrb[4].mxu0 %v1896_v18 }
  0x8c   :  { %1518 = vmatprep.mubr.msk.bf16.mxu0 %vm394_vm0, %v1898_v19 }
  0x93   :  { %490 = vmatmul.mubr.bf16.gmra.mrb[8].mxu0 %v1902_v22 }
  0x94   :  { %1519 = vmatprep.mubr.msk.bf16.mxu0 %vm394_vm0, %v1904_v23 }
  0x9b   :  { %500 = vmatmul.mubr.bf16.gmra.mrb[12].mxu0 %v1908_v26 }
  0x9c   :  { %1520 = vmatprep.mubr.msk.bf16.mxu0 %vm394_vm0, %v1910_v27 }
  0xa3   :  { %510 = vmatmul.mubr.bf16.gmra.mrb[16].mxu0 %v1629_v30 }
  0xa4   :  { %1521 = vmatprep.mubr.msk.bf16.mxu0 %vm394_vm0, %v1630_v32 }
  0xab   :  { %520 = vmatmul.mubr.bf16.gmra.mrb[20].mxu0 %v1632_v34 }
  0xac   :  { %1522 = vmatprep.mubr.msk.bf16.mxu0 %vm394_vm0, %v1633_v35 }
  0xb3   :  { %530 = vmatmul.mubr.bf16.gmra.mrb[24].mxu0 %v1635_v38 }
  0xb4   :  { %1523 = vmatprep.mubr.msk.bf16.mxu0 %vm394_vm0, %v1636_v39 }
  0xbb   :  { %540 = vmatmul.mubr.bf16.gmra.mrb[28].mxu0 %v1638_v42 }
  0xbc   :  { %1524 = vmatprep.mubr.msk.bf16.mxu0 %vm394_vm0, %v1639_v43 }
  0xc3   :  { %550 = vmatmul.mubr.bf16.gmra.mrb[32].mxu0 %v1641_v45 }
  0xc4   :  { %1525 = vmatprep.mubr.msk.bf16.mxu0 %vm394_vm0, %v1642_v46 }
  0xcb   :  { %560 = vmatmul.mubr.bf16.gmra.mrb[36].mxu0 %v1644_v47 }
  0xcc   :  { %1526 = vmatprep.mubr.msk.bf16.mxu0 %vm394_vm0, %v1645_v48 }
  0xd3   :  { %570 = vmatmul.mubr.bf16.gmra.mrb[40].mxu0 %v1647_v49 }
  0xd4   :  { %1527 = vmatprep.mubr.msk.bf16.mxu0 %vm394_vm0, %v1648_v50 }
  0xdb   :  { %580 = vmatmul.mubr.bf16.gmra.mrb[44].mxu0 %v1650_v51 }
  0xdc   :  { %1528 = vmatprep.mubr.msk.bf16.mxu0 %vm394_vm0, %v1651_v52 }
  0xe3   :  { %590 = vmatmul.mubr.bf16.gmra.mrb[48].mxu0 %v1653_v53 }
  0xe4   :  { %1529 = vmatprep.mubr.msk.bf16.mxu0 %vm394_vm0, %v1654_v54 }
  0xeb   :  { %600 = vmatmul.mubr.bf16.gmra.mrb[52].mxu0 %v1656_v55 }
 0x156   :  { %v471_v56 = vpop.f32.mrb[0].mxu0 }
 0x157   :  { %v473_v57 = vpop.f32.mrb[1].mxu0 }
 0x158   :  { %v475_v58 = vpop.f32.mrb[2].mxu0 }
 0x159   :  { %v610_v59 = vpack.c.bf16 %v475_v58, %v471_v56  ;;  %v477_v60 = vpop.f32.mrb[3].mxu0 }
 0x15a   :  { %v611_v61 = vpack.c.bf16 %v477_v60, %v473_v57 }
 0x15c   :  { %1530 = vmatprep.mubr.msk.bf16.mxu1 %vm394_vm0, %v611_v61 }
 0x15d   :  { %727 = vmatmul.mubr.bf16.vlgmr.msra.gmra.mrb[0].mxu1 %v610_v59 }
 0x15e   :  { %v481_v62 = vpop.f32.mrb[4].mxu0 }
 0x15f   :  { %v483_v63 = vpop.f32.mrb[5].mxu0 }
 0x160   :  { %v485_v0 = vpop.f32.mrb[6].mxu0 }
 0x161   :  { %v612_v1 = vpack.c.bf16 %v485_v0, %v481_v62  ;;  %v487_v2 = vpop.f32.mrb[7].mxu0 }
 0x162   :  { %v613_v3 = vpack.c.bf16 %v487_v2, %v483_v63 }
 0x164   :  { %1531 = vmatprep.mubr.msk.bf16.mxu1 %vm394_vm0, %v613_v3 }
 0x165   :  { %737 = vmatmul.mubr.bf16.gmra.mrb[4].mxu1 %v612_v1 }
 0x166   :  { %v491_v4 = vpop.f32.mrb[8].mxu0 }
 0x167   :  { %v493_v5 = vpop.f32.mrb[9].mxu0 }
 0x168   :  { %v495_v6 = vpop.f32.mrb[10].mxu0 }
 0x169   :  { %v614_v7 = vpack.c.bf16 %v495_v6, %v491_v4  ;;  %v497_v8 = vpop.f32.mrb[11].mxu0 }
 0x16a   :  { %v615_v9 = vpack.c.bf16 %v497_v8, %v493_v5 }
 0x16c   :  { %1532 = vmatprep.mubr.msk.bf16.mxu1 %vm394_vm0, %v615_v9 }
 0x16d   :  { %747 = vmatmul.mubr.bf16.gmra.mrb[8].mxu1 %v614_v7 }
 0x16e   :  { %v501_v10 = vpop.f32.mrb[12].mxu0 }
 0x16f   :  { %v503_v11 = vpop.f32.mrb[13].mxu0 }
 0x170   :  { %v505_v12 = vpop.f32.mrb[14].mxu0 }
 0x171   :  { %v616_v13 = vpack.c.bf16 %v505_v12, %v501_v10  ;;  %v507_v14 = vpop.f32.mrb[15].mxu0  ;;  %v1949_v12 = vld [vmem:[#allocation7] sm:$0xff] }
 0x172   :  { %v617_v15 = vpack.c.bf16 %v507_v14, %v503_v11  ;;  %v1659_v14 = vld [vmem:[#allocation8] sm:$0xff]  }
 0x174   :  { %1533 = vmatprep.mubr.msk.bf16.mxu1 %vm394_vm0, %v617_v15  ;;  %v1799_v15 = vmov 0  }
 0x175   :  { %757 = vmatmul.mubr.bf16.gmra.mrb[12].mxu1 %v616_v13  ;;  %v1545_v13 = vcombine.high %v1949_v12, %v1949_v12  ;;  %1399 = vmatprep.subr.bf16.mxu1 %v1799_v15 }
 0x176   :  { %v511_v16 = vpop.f32.mrb[16].mxu0  ;;  %1400 = vmatpush1.bf16.msra.mxu1 %v1659_v14 }
 0x177   :  { %v513_v17 = vpop.f32.mrb[17].mxu0  ;;  %1546 = vmatprep.mubr.msk.bf16.mxu0 %vm394_vm0, %v1545_v13  ;;  %1401 = vmatprep.subr.bf16.mxu1 %v1799_v15 }
 0x178   :  { %v515_v18 = vpop.f32.mrb[18].mxu0 }
 0x179   :  { %v618_v19 = vpack.c.bf16 %v515_v18, %v511_v16  ;;  %v517_v20 = vpop.f32.mrb[19].mxu0  ;;  %v1660_v16 = vld [vmem:[#allocation8 + $0x8] sm:$0xff]  }
 0x17a   :  { %v619_v21 = vpack.c.bf16 %v517_v20, %v513_v17  ;;  %1402 = vmatpush1.bf16.msra.mxu1 %v1660_v16 }
 0x17b   :  { %1403 = vmatprep.subr.bf16.mxu1 %v1799_v15 }
 0x17c   :  { %1534 = vmatprep.mubr.msk.bf16.mxu1 %vm394_vm0, %v619_v21 }
 0x17d   :  { %767 = vmatmul.mubr.bf16.gmra.mrb[16].mxu1 %v618_v19 }
 0x17e   :  { %v521_v22 = vpop.f32.mrb[20].mxu0 }
 0x17f   :  { %v523_v23 = vpop.f32.mrb[21].mxu0 }
 0x180   :  { %v525_v24 = vpop.f32.mrb[22].mxu0 }
 0x181   :  { %v620_v25 = vpack.c.bf16 %v525_v24, %v521_v22  ;;  %v527_v26 = vpop.f32.mrb[23].mxu0  ;;  %v1661_v22 = vld [vmem:[#allocation8 + $0x10] sm:$0xff]  }
 0x182   :  { %v621_v27 = vpack.c.bf16 %v527_v26, %v523_v23  ;;  %1404 = vmatpush1.bf16.msra.mxu1 %v1661_v22 }
 0x183   :  { %1405 = vmatprep.subr.bf16.mxu1 %v1799_v15 }
 0x184   :  { %1535 = vmatprep.mubr.msk.bf16.mxu1 %vm394_vm0, %v621_v27 }
 0x185   :  { %777 = vmatmul.mubr.bf16.gmra.mrb[20].mxu1 %v620_v25 }
 0x186   :  { %v531_v28 = vpop.f32.mrb[24].mxu0 }
 0x187   :  { %v533_v29 = vpop.f32.mrb[25].mxu0 }
 0x188   :  { %v535_v30 = vpop.f32.mrb[26].mxu0 }
 0x189   :  { %v622_v31 = vpack.c.bf16 %v535_v30, %v531_v28  ;;  %v537_v32 = vpop.f32.mrb[27].mxu0 }
 0x18a   :  { %v623_v33 = vpack.c.bf16 %v537_v32, %v533_v29  ;;  %v1662_v32 = vld [vmem:[#allocation8 + $0x18] sm:$0xff]  }
 0x18b   :  { %1406 = vmatpush1.bf16.msra.mxu1 %v1662_v32 }
 0x18c   :  { %1536 = vmatprep.mubr.msk.bf16.mxu1 %vm394_vm0, %v623_v33  ;;  %1407 = vmatprep.subr.bf16.mxu1 %v1799_v15 }
 0x18d   :  { %787 = vmatmul.mubr.bf16.gmra.mrb[24].mxu1 %v622_v31 }
 0x18e   :  { %v541_v34 = vpop.f32.mrb[28].mxu0 }
 0x18f   :  { %v543_v35 = vpop.f32.mrb[29].mxu0 }
 0x190   :  { %v545_v36 = vpop.f32.mrb[30].mxu0 }
 0x191   :  { %v624_v37 = vpack.c.bf16 %v545_v36, %v541_v34  ;;  %v547_v38 = vpop.f32.mrb[31].mxu0  ;;  %v1800_v34 = vmov 1.0  }
 0x192   :  { %v625_v39 = vpack.c.bf16 %v547_v38, %v543_v35 }
 0x194   :  { %1537 = vmatprep.mubr.msk.bf16.mxu1 %vm394_vm0, %v625_v39 }
 0x195   :  { %797 = vmatmul.mubr.bf16.gmra.mrb[28].mxu1 %v624_v37 }
 0x196   :  { %v551_v40 = vpop.f32.mrb[32].mxu0 }
 0x197   :  { %v553_v41 = vpop.f32.mrb[33].mxu0 }
 0x198   :  { %v555_v42 = vpop.f32.mrb[34].mxu0 }
 0x199   :  { %v626_v43 = vpack.c.bf16 %v555_v42, %v551_v40  ;;  %v557_v44 = vpop.f32.mrb[35].mxu0 }
 0x19a   :  { %v627_v45 = vpack.c.bf16 %v557_v44, %v553_v41 }
 0x19c   :  { %1538 = vmatprep.mubr.msk.bf16.mxu1 %vm394_vm0, %v627_v45  ;;  %v1663_v45 = vld [vmem:[#allocation8 + $0x20] sm:$0xff]  }
 0x19d   :  { %807 = vmatmul.mubr.bf16.gmra.mrb[32].mxu1 %v626_v43 }
 0x19e   :  { %v561_v46 = vpop.f32.mrb[36].mxu0  ;;  %1408 = vmatpush1.bf16.msra.mxu1 %v1663_v45 }
 0x19f   :  { %v563_v47 = vpop.f32.mrb[37].mxu0  ;;  %1409 = vmatprep.subr.bf16.mxu1 %v1799_v15 }
 0x1a0   :  { %v565_v48 = vpop.f32.mrb[38].mxu0 }
 0x1a1   :  { %v628_v49 = vpack.c.bf16 %v565_v48, %v561_v46  ;;  %v567_v50 = vpop.f32.mrb[39].mxu0 }
 0x1a2   :  { %v629_v51 = vpack.c.bf16 %v567_v50, %v563_v47 }
 0x1a4   :  { %1539 = vmatprep.mubr.msk.bf16.mxu1 %vm394_vm0, %v629_v51 }
 0x1a5   :  { %817 = vmatmul.mubr.bf16.gmra.mrb[36].mxu1 %v628_v49 }
 0x1a6   :  { %v571_v52 = vpop.f32.mrb[40].mxu0 }
 0x1a7   :  { %v573_v53 = vpop.f32.mrb[41].mxu0 }
 0x1a8   :  { %v575_v54 = vpop.f32.mrb[42].mxu0 }
 0x1a9   :  { %v630_v55 = vpack.c.bf16 %v575_v54, %v571_v52  ;;  %v577_v56 = vpop.f32.mrb[43].mxu0 }
 0x1aa   :  { %v631_v57 = vpack.c.bf16 %v577_v56, %v573_v53 }
 0x1ac   :  { %1540 = vmatprep.mubr.msk.bf16.mxu1 %vm394_vm0, %v631_v57 }
 0x1ad   :  { %827 = vmatmul.mubr.bf16.gmra.mrb[40].mxu1 %v630_v55 }
 0x1ae   :  { %v581_v58 = vpop.f32.mrb[44].mxu0 }
 0x1af   :  { %v583_v59 = vpop.f32.mrb[45].mxu0 }
 0x1b0   :  { %v585_v60 = vpop.f32.mrb[46].mxu0 }
 0x1b1   :  { %v632_v61 = vpack.c.bf16 %v585_v60, %v581_v58  ;;  %v587_v62 = vpop.f32.mrb[47].mxu0 }
 0x1b2   :  { %v633_v63 = vpack.c.bf16 %v587_v62, %v583_v59 }
 0x1b4   :  { %1541 = vmatprep.mubr.msk.bf16.mxu1 %vm394_vm0, %v633_v63 }
 0x1b5   :  { %837 = vmatmul.mubr.bf16.gmra.mrb[44].mxu1 %v632_v61  ;;  %v1664_v61 = vld [vmem:[#allocation8 + $0x28] sm:$0xff]  }
 0x1b6   :  { %v591_v0 = vpop.f32.mrb[48].mxu0  ;;  %1410 = vmatpush1.bf16.msra.mxu1 %v1664_v61 }
 0x1b7   :  { %v593_v1 = vpop.f32.mrb[49].mxu0  ;;  %1411 = vmatprep.subr.bf16.mxu1 %v1799_v15 }
 0x1b8   :  { %v595_v2 = vpop.f32.mrb[50].mxu0 }
 0x1b9   :  { %v634_v3 = vpack.c.bf16 %v595_v2, %v591_v0  ;;  %v597_v4 = vpop.f32.mrb[51].mxu0 }
 0x1ba   :  { %v635_v5 = vpack.c.bf16 %v597_v4, %v593_v1 }
 0x1bc   :  { %1542 = vmatprep.mubr.msk.bf16.mxu1 %vm394_vm0, %v635_v5 }
 0x1bd   :  { %847 = vmatmul.mubr.bf16.gmra.mrb[48].mxu1 %v634_v3 }
 0x1be   :  { %v601_v6 = vpop.f32.mrb[52].mxu0 }
 0x1bf   :  { %v603_v7 = vpop.f32.mrb[53].mxu0 }
 0x1c0   :  { %v605_v8 = vpop.f32.mrb[54].mxu0 }
 0x1c1   :  { %v636_v9 = vpack.c.bf16 %v605_v8, %v601_v6  ;;  %v607_v10 = vpop.f32.mrb[55].mxu0 }
 0x1c2   :  { %v637_v11 = vpack.c.bf16 %v607_v10, %v603_v7 }
 0x1c4   :  { %1543 = vmatprep.mubr.msk.bf16.mxu1 %vm394_vm0, %v637_v11 }
 0x1c5   :  { %857 = vmatmul.mubr.bf16.gmra.mrb[52].mxu1 %v636_v9  ;;  %v1665_v9 = vld [vmem:[#allocation8 + $0x30] sm:$0xff]  }
 0x1c6   :  { %1412 = vmatpush1.bf16.msra.mxu1 %v1665_v9 }
 0x1c7   :  { %1413 = vmatprep.subr.bf16.mxu1 %v1799_v15 }
 0x230   :  { %v728_v17 = vpop.f32.mrb[0].mxu1 }
 0x231   :  { %v867_v18 = vmax.f32 %v728_v17, 0.0  ;;  %v730_v19 = vpop.f32.mrb[1].mxu1 }
 0x232   :  { %v868_v20 = vmax.f32 %v730_v19, 0.0  ;;  %v732_v21 = vpop.f32.mrb[2].mxu1 }
 0x233   :  { %v923_v23 = vmin.f32 %v867_v18, 1.0  ;;  %v869_v24 = vmax.f32 %v732_v21, 0.0  ;;  %v734_v25 = vpop.f32.mrb[3].mxu1 }
 0x234   :  { %v924_v26 = vmin.f32 %v868_v20, 1.0  ;;  %v870_v27 = vmax.f32 %v734_v25, 0.0 }
 0x235   :  { %v979_v28 = vsub.f32 1.0, %v923_v23  ;;  %v925_v29 = vmin.f32 %v869_v24, 1.0 }
 0x236   :  { %v980_v30 = vsub.f32 1.0, %v924_v26  ;;  %v926_v31 = vmin.f32 %v870_v27, 1.0  ;;  %v1666_v27 = vld [vmem:[#allocation8 + $0x38] sm:$0xff]  }
 0x237   :  { %vm1035_vm1 = vcmp.lt.f32.partialorder %v979_v28, 0.5  ;;  %v981_v33 = vsub.f32 1.0, %v925_v29  ;;  %1414 = vmatpush1.bf16.msra.mxu1 %v1666_v27 }
 0x238   :  { %v1091_v35 = vsel %vm1035_vm1, 0.0, %v1800_v34  ;;  %vm1036_vm2 = vcmp.lt.f32.partialorder %v980_v30, 0.5  ;;  %v982_v36 = vsub.f32 1.0, %v926_v31  ;;  %v738_v37 = vpop.f32.mrb[4].mxu1  ;;  %1415 = vmatprep.subr.bf16.mxu1 %v1799_v15 }
 0x239   :  { %v1092_v38 = vsel %vm1036_vm2, 0.0, %v1800_v34  ;;  %vm1037_vm3 = vcmp.lt.f32.partialorder %v981_v33, 0.5  ;;  %v871_v39 = vmax.f32 %v738_v37, 0.0  ;;  %v740_v40 = vpop.f32.mrb[5].mxu1  ;;  %v1147_v41 = vsub.f32 1.0, %v1091_v35 }
 0x23a   :  { %v1093_v42 = vsel %vm1037_vm3, 0.0, %v1800_v34  ;;  %vm1038_vm4 = vcmp.lt.f32.partialorder %v982_v36, 0.5  ;;  %v872_v43 = vmax.f32 %v740_v40, 0.0  ;;  %v742_v44 = vpop.f32.mrb[6].mxu1  ;;  %v1148_v51 = vsub.f32 1.0, %v1092_v38  ;;  %v1667_v40 = vld [vmem:[#allocation8 + $0x40] sm:$0xff]  }
 0x23b   :  { %v1149_v46 = vsub.f32 1.0, %v1093_v42  ;;  %v1094_v47 = vsel %vm1038_vm4, 0.0, %v1800_v34  ;;  %v927_v48 = vmin.f32 %v871_v39, 1.0  ;;  %v873_v49 = vmax.f32 %v742_v44, 0.0  ;;  %v744_v50 = vpop.f32.mrb[7].mxu1  ;;  %1416 = vmatpush1.bf16.msra.mxu1 %v1667_v40 }
 0x23c   :  { %v1150_v52 = vsub.f32 1.0, %v1094_v47  ;;  %v928_v53 = vmin.f32 %v872_v43, 1.0  ;;  %v874_v54 = vmax.f32 %v744_v50, 0.0  ;;  %1417 = vmatprep.subr.bf16.mxu1 %v1799_v15 }
 0x23d   :  { %v1203_v55 = vpack.c.bf16 %v1149_v46, %v1147_v41  ;;  %v983_v56 = vsub.f32 1.0, %v927_v48  ;;  %v929_v57 = vmin.f32 %v873_v49, 1.0 }
 0x23e   :  { %v984_v58 = vsub.f32 1.0, %v928_v53  ;;  %v930_v59 = vmin.f32 %v874_v54, 1.0  ;;  %v1204_v60 = vpack.c.bf16 %v1150_v52, %v1148_v51 }
 0x23f   :  { %vm1039_vm5 = vcmp.lt.f32.partialorder %v983_v56, 0.5  ;;  %v985_v62 = vsub.f32 1.0, %v929_v57  ;;  %v1668_v56 = vld [vmem:[#allocation8 + $0x48] sm:$0xff]  }
 0x240   :  { %v1095_v63 = vsel %vm1039_vm5, 0.0, %v1800_v34  ;;  %vm1040_vm6 = vcmp.lt.f32.partialorder %v984_v58, 0.5  ;;  %v986_v0 = vsub.f32 1.0, %v930_v59  ;;  %v748_v1 = vpop.f32.mrb[8].mxu1  ;;  %1241 = vmatprep.subr.bf16.mxu0 %v1204_v60  ;;  %1418 = vmatpush1.bf16.msra.mxu1 %v1668_v56 }
 0x241   :  { %v1096_v2 = vsel %vm1040_vm6, 0.0, %v1800_v34  ;;  %vm1041_vm7 = vcmp.lt.f32.partialorder %v985_v62, 0.5  ;;  %v875_v3 = vmax.f32 %v748_v1, 0.0  ;;  %v750_v4 = vpop.f32.mrb[9].mxu1  ;;  %1242 = vmatpush1.bf16.msra.mxu0 %v1203_v55  ;;  %v1151_v5 = vsub.f32 1.0, %v1095_v63  ;;  %1419 = vmatprep.subr.bf16.mxu1 %v1799_v15 }
 0x242   :  { %v1097_v6 = vsel %vm1041_vm7, 0.0, %v1800_v34  ;;  %vm1042_vm8 = vcmp.lt.f32.partialorder %v986_v0, 0.5  ;;  %v876_v7 = vmax.f32 %v750_v4, 0.0  ;;  %v752_v8 = vpop.f32.mrb[10].mxu1  ;;  %v1152_v17 = vsub.f32 1.0, %v1096_v2  ;;  %v1669_v4 = vld [vmem:[#allocation8 + $0x50] sm:$0xff]  }
 0x243   :  { %v1153_v10 = vsub.f32 1.0, %v1097_v6  ;;  %v1098_v11 = vsel %vm1042_vm8, 0.0, %v1800_v34  ;;  %v931_v13 = vmin.f32 %v875_v3, 1.0  ;;  %v877_v14 = vmax.f32 %v752_v8, 0.0  ;;  %v754_v16 = vpop.f32.mrb[11].mxu1 }
 0x244   :  { %v1154_v18 = vsub.f32 1.0, %v1098_v11  ;;  %v932_v19 = vmin.f32 %v876_v7, 1.0  ;;  %v878_v20 = vmax.f32 %v754_v16, 0.0  ;;  %1420 = vmatpush1.bf16.msra.mxu1 %v1669_v4 }
 0x245   :  { %v1205_v21 = vpack.c.bf16 %v1153_v10, %v1151_v5  ;;  %v987_v22 = vsub.f32 1.0, %v931_v13  ;;  %v933_v23 = vmin.f32 %v877_v14, 1.0  ;;  %1421 = vmatprep.subr.bf16.mxu1 %v1799_v15 }
 0x246   :  { %v988_v24 = vsub.f32 1.0, %v932_v19  ;;  %v934_v25 = vmin.f32 %v878_v20, 1.0  ;;  %v1206_v26 = vpack.c.bf16 %v1154_v18, %v1152_v17 }
 0x247   :  { %vm1043_vm9 = vcmp.lt.f32.partialorder %v987_v22, 0.5  ;;  %v989_v28 = vsub.f32 1.0, %v933_v23  ;;  %v1670_v22 = vld [vmem:[#allocation8 + $0x58] sm:$0xff]  }
 0x248   :  { %v1099_v29 = vsel %vm1043_vm9, 0.0, %v1800_v34  ;;  %vm1044_vm10 = vcmp.lt.f32.partialorder %v988_v24, 0.5  ;;  %v990_v30 = vsub.f32 1.0, %v934_v25  ;;  %v758_v31 = vpop.f32.mrb[12].mxu1  ;;  %1243 = vmatprep.subr.bf16.mxu0 %v1206_v26  ;;  %1422 = vmatpush1.bf16.msra.mxu1 %v1670_v22 }
 0x249   :  { %v1100_v32 = vsel %vm1044_vm10, 0.0, %v1800_v34  ;;  %vm1045_vm11 = vcmp.lt.f32.partialorder %v989_v28, 0.5  ;;  %v879_v33 = vmax.f32 %v758_v31, 0.0  ;;  %v760_v35 = vpop.f32.mrb[13].mxu1  ;;  %1244 = vmatpush1.bf16.msra.mxu0 %v1205_v21  ;;  %v1155_v36 = vsub.f32 1.0, %v1099_v29  ;;  %1423 = vmatprep.subr.bf16.mxu1 %v1799_v15 }
 0x24a   :  { %v1101_v37 = vsel %vm1045_vm11, 0.0, %v1800_v34  ;;  %vm1046_vm12 = vcmp.lt.f32.partialorder %v990_v30, 0.5  ;;  %v880_v38 = vmax.f32 %v760_v35, 0.0  ;;  %v762_v39 = vpop.f32.mrb[14].mxu1  ;;  %v1156_v46 = vsub.f32 1.0, %v1100_v32  ;;  %v1671_v35 = vld [vmem:[#allocation8 + $0x60] sm:$0xff]  }
 0x24b   :  { %v1157_v41 = vsub.f32 1.0, %v1101_v37  ;;  %v1102_v42 = vsel %vm1046_vm12, 0.0, %v1800_v34  ;;  %v935_v43 = vmin.f32 %v879_v33, 1.0  ;;  %v881_v44 = vmax.f32 %v762_v39, 0.0  ;;  %v764_v45 = vpop.f32.mrb[15].mxu1 }
 0x24c   :  { %v1158_v47 = vsub.f32 1.0, %v1102_v42  ;;  %v936_v48 = vmin.f32 %v880_v38, 1.0  ;;  %v882_v49 = vmax.f32 %v764_v45, 0.0  ;;  %1424 = vmatpush1.bf16.msra.mxu1 %v1671_v35 }
 0x24d   :  { %v1207_v50 = vpack.c.bf16 %v1157_v41, %v1155_v36  ;;  %v991_v51 = vsub.f32 1.0, %v935_v43  ;;  %v937_v52 = vmin.f32 %v881_v44, 1.0  ;;  %1425 = vmatprep.subr.bf16.mxu1 %v1799_v15 }
 0x24e   :  { %v992_v53 = vsub.f32 1.0, %v936_v48  ;;  %v938_v54 = vmin.f32 %v882_v49, 1.0  ;;  %v1208_v55 = vpack.c.bf16 %v1158_v47, %v1156_v46 }
 0x24f   :  { %vm1047_vm13 = vcmp.lt.f32.partialorder %v991_v51, 0.5  ;;  %v993_v57 = vsub.f32 1.0, %v937_v52 }
 0x250   :  { %v1103_v58 = vsel %vm1047_vm13, 0.0, %v1800_v34  ;;  %vm1048_vm14 = vcmp.lt.f32.partialorder %v992_v53, 0.5  ;;  %v994_v59 = vsub.f32 1.0, %v938_v54  ;;  %v768_v60 = vpop.f32.mrb[16].mxu1  ;;  %1245 = vmatprep.subr.bf16.mxu0 %v1208_v55 }
 0x251   :  { %v1104_v61 = vsel %vm1048_vm14, 0.0, %v1800_v34  ;;  %vm1049_vm15 = vcmp.lt.f32.partialorder %v993_v57, 0.5  ;;  %v883_v62 = vmax.f32 %v768_v60, 0.0  ;;  %v770_v63 = vpop.f32.mrb[17].mxu1  ;;  %1246 = vmatpush1.bf16.msra.mxu0 %v1207_v50  ;;  %v1159_v0 = vsub.f32 1.0, %v1103_v58 }
 0x252   :  { %v1105_v1 = vsel %vm1049_vm15, 0.0, %v1800_v34  ;;  %vm1050_vm1 = vcmp.lt.f32.partialorder %v994_v59, 0.5  ;;  %v884_v2 = vmax.f32 %v770_v63, 0.0  ;;  %v772_v3 = vpop.f32.mrb[18].mxu1  ;;  %v1160_v10 = vsub.f32 1.0, %v1104_v61 }
 0x253   :  { %v1161_v5 = vsub.f32 1.0, %v1105_v1  ;;  %v1106_v6 = vsel %vm1050_vm1, 0.0, %v1800_v34  ;;  %v939_v7 = vmin.f32 %v883_v62, 1.0  ;;  %v885_v8 = vmax.f32 %v772_v3, 0.0  ;;  %v774_v9 = vpop.f32.mrb[19].mxu1 }
 0x254   :  { %v1162_v11 = vsub.f32 1.0, %v1106_v6  ;;  %v940_v13 = vmin.f32 %v884_v2, 1.0  ;;  %v886_v14 = vmax.f32 %v774_v9, 0.0 }
 0x255   :  { %v1209_v16 = vpack.c.bf16 %v1161_v5, %v1159_v0  ;;  %v995_v17 = vsub.f32 1.0, %v939_v7  ;;  %v941_v18 = vmin.f32 %v885_v8, 1.0 }
 0x256   :  { %v996_v19 = vsub.f32 1.0, %v940_v13  ;;  %v942_v20 = vmin.f32 %v886_v14, 1.0  ;;  %v1210_v21 = vpack.c.bf16 %v1162_v11, %v1160_v10 }
 0x257   :  { %vm1051_vm2 = vcmp.lt.f32.partialorder %v995_v17, 0.5  ;;  %v997_v23 = vsub.f32 1.0, %v941_v18 }
 0x258   :  { %v1107_v24 = vsel %vm1051_vm2, 0.0, %v1800_v34  ;;  %vm1052_vm3 = vcmp.lt.f32.partialorder %v996_v19, 0.5  ;;  %v998_v25 = vsub.f32 1.0, %v942_v20  ;;  %v778_v26 = vpop.f32.mrb[20].mxu1  ;;  %1247 = vmatprep.subr.bf16.mxu0 %v1210_v21 }
 0x259   :  { %v1108_v27 = vsel %vm1052_vm3, 0.0, %v1800_v34  ;;  %vm1053_vm4 = vcmp.lt.f32.partialorder %v997_v23, 0.5  ;;  %v887_v28 = vmax.f32 %v778_v26, 0.0  ;;  %v780_v29 = vpop.f32.mrb[21].mxu1  ;;  %1248 = vmatpush1.bf16.msra.mxu0 %v1209_v16  ;;  %v1163_v30 = vsub.f32 1.0, %v1107_v24 }
 0x25a   :  { %v1109_v31 = vsel %vm1053_vm4, 0.0, %v1800_v34  ;;  %vm1054_vm5 = vcmp.lt.f32.partialorder %v998_v25, 0.5  ;;  %v888_v32 = vmax.f32 %v780_v29, 0.0  ;;  %v782_v33 = vpop.f32.mrb[22].mxu1  ;;  %v1164_v41 = vsub.f32 1.0, %v1108_v27 }
 0x25b   :  { %v1165_v36 = vsub.f32 1.0, %v1109_v31  ;;  %v1110_v37 = vsel %vm1054_vm5, 0.0, %v1800_v34  ;;  %v943_v38 = vmin.f32 %v887_v28, 1.0  ;;  %v889_v39 = vmax.f32 %v782_v33, 0.0  ;;  %v784_v40 = vpop.f32.mrb[23].mxu1 }
 0x25c   :  { %v1166_v42 = vsub.f32 1.0, %v1110_v37  ;;  %v944_v43 = vmin.f32 %v888_v32, 1.0  ;;  %v890_v44 = vmax.f32 %v784_v40, 0.0 }
 0x25d   :  { %v1211_v45 = vpack.c.bf16 %v1165_v36, %v1163_v30  ;;  %v999_v46 = vsub.f32 1.0, %v943_v38  ;;  %v945_v47 = vmin.f32 %v889_v39, 1.0 }
 0x25e   :  { %v1000_v48 = vsub.f32 1.0, %v944_v43  ;;  %v946_v49 = vmin.f32 %v890_v44, 1.0  ;;  %v1212_v50 = vpack.c.bf16 %v1166_v42, %v1164_v41 }
 0x25f   :  { %vm1055_vm6 = vcmp.lt.f32.partialorder %v999_v46, 0.5  ;;  %v1001_v51 = vsub.f32 1.0, %v945_v47 }
 0x260   :  { %v1111_v52 = vsel %vm1055_vm6, 0.0, %v1800_v34  ;;  %vm1056_vm7 = vcmp.lt.f32.partialorder %v1000_v48, 0.5  ;;  %v1002_v53 = vsub.f32 1.0, %v946_v49  ;;  %v788_v54 = vpop.f32.mrb[24].mxu1  ;;  %1249 = vmatprep.subr.bf16.mxu0 %v1212_v50 }
 0x261   :  { %v1112_v55 = vsel %vm1056_vm7, 0.0, %v1800_v34  ;;  %vm1057_vm8 = vcmp.lt.f32.partialorder %v1001_v51, 0.5  ;;  %v891_v56 = vmax.f32 %v788_v54, 0.0  ;;  %v790_v57 = vpop.f32.mrb[25].mxu1  ;;  %1250 = vmatpush1.bf16.msra.mxu0 %v1211_v45  ;;  %v1167_v58 = vsub.f32 1.0, %v1111_v52 }
 0x262   :  { %v1113_v59 = vsel %vm1057_vm8, 0.0, %v1800_v34  ;;  %vm1058_vm9 = vcmp.lt.f32.partialorder %v1002_v53, 0.5  ;;  %v892_v60 = vmax.f32 %v790_v57, 0.0  ;;  %v792_v61 = vpop.f32.mrb[26].mxu1  ;;  %v1168_v2 = vsub.f32 1.0, %v1112_v55 }
 0x263   :  { %v1169_v62 = vsub.f32 1.0, %v1113_v59  ;;  %v1114_v15 = vsel %vm1058_vm9, 0.0, %v1800_v34  ;;  %v947_v63 = vmin.f32 %v891_v56, 1.0  ;;  %v893_v0 = vmax.f32 %v792_v61, 0.0  ;;  %v794_v1 = vpop.f32.mrb[27].mxu1 }
 0x264   :  { %v1170_v3 = vsub.f32 1.0, %v1114_v15  ;;  %v948_v4 = vmin.f32 %v892_v60, 1.0  ;;  %v894_v5 = vmax.f32 %v794_v1, 0.0 }
 0x265   :  { %v1213_v6 = vpack.c.bf16 %v1169_v62, %v1167_v58  ;;  %v1003_v7 = vsub.f32 1.0, %v947_v63  ;;  %v949_v8 = vmin.f32 %v893_v0, 1.0 }
 0x266   :  { %v1004_v9 = vsub.f32 1.0, %v948_v4  ;;  %v950_v10 = vmin.f32 %v894_v5, 1.0  ;;  %v1214_v11 = vpack.c.bf16 %v1170_v3, %v1168_v2 }
 0x267   :  { %vm1059_vm10 = vcmp.lt.f32.partialorder %v1003_v7, 0.5  ;;  %v1005_v13 = vsub.f32 1.0, %v949_v8 }
 0x268   :  { %v1115_v14 = vsel %vm1059_vm10, 0.0, %v1800_v34  ;;  %vm1060_vm11 = vcmp.lt.f32.partialorder %v1004_v9, 0.5  ;;  %v1006_v16 = vsub.f32 1.0, %v950_v10  ;;  %v798_v17 = vpop.f32.mrb[28].mxu1  ;;  %1251 = vmatprep.subr.bf16.mxu0 %v1214_v11 }
 0x269   :  { %v1116_v18 = vsel %vm1060_vm11, 0.0, %v1800_v34  ;;  %vm1061_vm12 = vcmp.lt.f32.partialorder %v1005_v13, 0.5  ;;  %v895_v19 = vmax.f32 %v798_v17, 0.0  ;;  %v800_v20 = vpop.f32.mrb[29].mxu1  ;;  %1252 = vmatpush1.bf16.msra.mxu0 %v1213_v6  ;;  %v1171_v21 = vsub.f32 1.0, %v1115_v14 }
 0x26a   :  { %v1117_v22 = vsel %vm1061_vm12, 0.0, %v1800_v34  ;;  %vm1062_vm13 = vcmp.lt.f32.partialorder %v1006_v16, 0.5  ;;  %v896_v23 = vmax.f32 %v800_v20, 0.0  ;;  %v802_v24 = vpop.f32.mrb[30].mxu1  ;;  %v1172_v30 = vsub.f32 1.0, %v1116_v18 }
 0x26b   :  { %v1173_v25 = vsub.f32 1.0, %v1117_v22  ;;  %v1118_v26 = vsel %vm1062_vm13, 0.0, %v1800_v34  ;;  %v951_v27 = vmin.f32 %v895_v19, 1.0  ;;  %v897_v28 = vmax.f32 %v802_v24, 0.0  ;;  %v804_v29 = vpop.f32.mrb[31].mxu1 }
 0x26c   :  { %v1174_v31 = vsub.f32 1.0, %v1118_v26  ;;  %v952_v32 = vmin.f32 %v896_v23, 1.0  ;;  %v898_v33 = vmax.f32 %v804_v29, 0.0 }
 0x26d   :  { %v1215_v35 = vpack.c.bf16 %v1173_v25, %v1171_v21  ;;  %v1007_v36 = vsub.f32 1.0, %v951_v27  ;;  %v953_v37 = vmin.f32 %v897_v28, 1.0 }
 0x26e   :  { %v1008_v38 = vsub.f32 1.0, %v952_v32  ;;  %v954_v39 = vmin.f32 %v898_v33, 1.0  ;;  %v1216_v40 = vpack.c.bf16 %v1174_v31, %v1172_v30 }
 0x26f   :  { %vm1063_vm14 = vcmp.lt.f32.partialorder %v1007_v36, 0.5  ;;  %v1009_v41 = vsub.f32 1.0, %v953_v37 }
 0x270   :  { %v1119_v42 = vsel %vm1063_vm14, 0.0, %v1800_v34  ;;  %vm1064_vm15 = vcmp.lt.f32.partialorder %v1008_v38, 0.5  ;;  %v1010_v43 = vsub.f32 1.0, %v954_v39  ;;  %v808_v44 = vpop.f32.mrb[32].mxu1  ;;  %1253 = vmatprep.subr.bf16.mxu0 %v1216_v40 }
 0x271   :  { %v1120_v45 = vsel %vm1064_vm15, 0.0, %v1800_v34  ;;  %vm1065_vm1 = vcmp.lt.f32.partialorder %v1009_v41, 0.5  ;;  %v899_v46 = vmax.f32 %v808_v44, 0.0  ;;  %v810_v47 = vpop.f32.mrb[33].mxu1  ;;  %1254 = vmatpush1.bf16.msra.mxu0 %v1215_v35  ;;  %v1175_v48 = vsub.f32 1.0, %v1119_v42 }
 0x272   :  { %v1121_v49 = vsel %vm1065_vm1, 0.0, %v1800_v34  ;;  %vm1066_vm2 = vcmp.lt.f32.partialorder %v1010_v43, 0.5  ;;  %v900_v50 = vmax.f32 %v810_v47, 0.0  ;;  %v812_v51 = vpop.f32.mrb[34].mxu1  ;;  %v1176_v57 = vsub.f32 1.0, %v1120_v45 }
 0x273   :  { %v1177_v52 = vsub.f32 1.0, %v1121_v49  ;;  %v1122_v53 = vsel %vm1066_vm2, 0.0, %v1800_v34  ;;  %v955_v54 = vmin.f32 %v899_v46, 1.0  ;;  %v901_v55 = vmax.f32 %v812_v51, 0.0  ;;  %v814_v56 = vpop.f32.mrb[35].mxu1 }
 0x274   :  { %v1178_v58 = vsub.f32 1.0, %v1122_v53  ;;  %v956_v59 = vmin.f32 %v900_v50, 1.0  ;;  %v902_v60 = vmax.f32 %v814_v56, 0.0 }
 0x275   :  { %v1217_v61 = vpack.c.bf16 %v1177_v52, %v1175_v48  ;;  %v1011_v62 = vsub.f32 1.0, %v955_v54  ;;  %v957_v15 = vmin.f32 %v901_v55, 1.0 }
 0x276   :  { %v1012_v63 = vsub.f32 1.0, %v956_v59  ;;  %v958_v0 = vmin.f32 %v902_v60, 1.0  ;;  %v1218_v1 = vpack.c.bf16 %v1178_v58, %v1176_v57 }
 0x277   :  { %vm1067_vm3 = vcmp.lt.f32.partialorder %v1011_v62, 0.5  ;;  %v1013_v2 = vsub.f32 1.0, %v957_v15 }
 0x278   :  { %v1123_v3 = vsel %vm1067_vm3, 0.0, %v1800_v34  ;;  %vm1068_vm4 = vcmp.lt.f32.partialorder %v1012_v63, 0.5  ;;  %v1014_v4 = vsub.f32 1.0, %v958_v0  ;;  %v818_v5 = vpop.f32.mrb[36].mxu1  ;;  %1255 = vmatprep.subr.bf16.mxu0 %v1218_v1 }
 0x279   :  { %v1124_v6 = vsel %vm1068_vm4, 0.0, %v1800_v34  ;;  %vm1069_vm5 = vcmp.lt.f32.partialorder %v1013_v2, 0.5  ;;  %v903_v7 = vmax.f32 %v818_v5, 0.0  ;;  %v820_v8 = vpop.f32.mrb[37].mxu1  ;;  %1256 = vmatpush1.bf16.msra.mxu0 %v1217_v61  ;;  %v1179_v9 = vsub.f32 1.0, %v1123_v3 }
 0x27a   :  { %v1125_v10 = vsel %vm1069_vm5, 0.0, %v1800_v34  ;;  %vm1070_vm6 = vcmp.lt.f32.partialorder %v1014_v4, 0.5  ;;  %v904_v11 = vmax.f32 %v820_v8, 0.0  ;;  %v822_v13 = vpop.f32.mrb[38].mxu1  ;;  %v1180_v20 = vsub.f32 1.0, %v1124_v6 }
 0x27b   :  { %v1181_v14 = vsub.f32 1.0, %v1125_v10  ;;  %v1126_v16 = vsel %vm1070_vm6, 0.0, %v1800_v34  ;;  %v959_v17 = vmin.f32 %v903_v7, 1.0  ;;  %v905_v18 = vmax.f32 %v822_v13, 0.0  ;;  %v824_v19 = vpop.f32.mrb[39].mxu1 }
 0x27c   :  { %v1182_v21 = vsub.f32 1.0, %v1126_v16  ;;  %v960_v22 = vmin.f32 %v904_v11, 1.0  ;;  %v906_v23 = vmax.f32 %v824_v19, 0.0 }
 0x27d   :  { %v1219_v24 = vpack.c.bf16 %v1181_v14, %v1179_v9  ;;  %v1015_v25 = vsub.f32 1.0, %v959_v17  ;;  %v961_v26 = vmin.f32 %v905_v18, 1.0 }
 0x27e   :  { %v1016_v27 = vsub.f32 1.0, %v960_v22  ;;  %v962_v28 = vmin.f32 %v906_v23, 1.0  ;;  %v1220_v29 = vpack.c.bf16 %v1182_v21, %v1180_v20 }
 0x27f   :  { %vm1071_vm7 = vcmp.lt.f32.partialorder %v1015_v25, 0.5  ;;  %v1017_v30 = vsub.f32 1.0, %v961_v26 }
 0x280   :  { %v1127_v31 = vsel %vm1071_vm7, 0.0, %v1800_v34  ;;  %vm1072_vm8 = vcmp.lt.f32.partialorder %v1016_v27, 0.5  ;;  %v1018_v32 = vsub.f32 1.0, %v962_v28  ;;  %v828_v33 = vpop.f32.mrb[40].mxu1  ;;  %1257 = vmatprep.subr.bf16.mxu0 %v1220_v29 }
 0x281   :  { %v1128_v35 = vsel %vm1072_vm8, 0.0, %v1800_v34  ;;  %vm1073_vm9 = vcmp.lt.f32.partialorder %v1017_v30, 0.5  ;;  %v907_v36 = vmax.f32 %v828_v33, 0.0  ;;  %v830_v37 = vpop.f32.mrb[41].mxu1  ;;  %1258 = vmatpush1.bf16.msra.mxu0 %v1219_v24  ;;  %v1183_v38 = vsub.f32 1.0, %v1127_v31 }
 0x282   :  { %v1129_v39 = vsel %vm1073_vm9, 0.0, %v1800_v34  ;;  %vm1074_vm10 = vcmp.lt.f32.partialorder %v1018_v32, 0.5  ;;  %v908_v40 = vmax.f32 %v830_v37, 0.0  ;;  %v832_v41 = vpop.f32.mrb[42].mxu1  ;;  %v1184_v47 = vsub.f32 1.0, %v1128_v35 }
 0x283   :  { %v1185_v42 = vsub.f32 1.0, %v1129_v39  ;;  %v1130_v43 = vsel %vm1074_vm10, 0.0, %v1800_v34  ;;  %v963_v44 = vmin.f32 %v907_v36, 1.0  ;;  %v909_v45 = vmax.f32 %v832_v41, 0.0  ;;  %v834_v46 = vpop.f32.mrb[43].mxu1 }
 0x284   :  { %v1186_v48 = vsub.f32 1.0, %v1130_v43  ;;  %v964_v49 = vmin.f32 %v908_v40, 1.0  ;;  %v910_v50 = vmax.f32 %v834_v46, 0.0 }
 0x285   :  { %v1221_v51 = vpack.c.bf16 %v1185_v42, %v1183_v38  ;;  %v1019_v52 = vsub.f32 1.0, %v963_v44  ;;  %v965_v53 = vmin.f32 %v909_v45, 1.0 }
 0x286   :  { %v1020_v54 = vsub.f32 1.0, %v964_v49  ;;  %v966_v55 = vmin.f32 %v910_v50, 1.0  ;;  %v1222_v56 = vpack.c.bf16 %v1186_v48, %v1184_v47 }
 0x287   :  { %vm1075_vm11 = vcmp.lt.f32.partialorder %v1019_v52, 0.5  ;;  %v1021_v57 = vsub.f32 1.0, %v965_v53 }
 0x288   :  { %v1131_v58 = vsel %vm1075_vm11, 0.0, %v1800_v34  ;;  %vm1076_vm12 = vcmp.lt.f32.partialorder %v1020_v54, 0.5  ;;  %v1022_v59 = vsub.f32 1.0, %v966_v55  ;;  %v838_v60 = vpop.f32.mrb[44].mxu1  ;;  %1259 = vmatprep.subr.bf16.mxu0 %v1222_v56 }
 0x289   :  { %v1132_v61 = vsel %vm1076_vm12, 0.0, %v1800_v34  ;;  %vm1077_vm13 = vcmp.lt.f32.partialorder %v1021_v57, 0.5  ;;  %v911_v62 = vmax.f32 %v838_v60, 0.0  ;;  %v840_v15 = vpop.f32.mrb[45].mxu1  ;;  %1260 = vmatpush1.bf16.msra.mxu0 %v1221_v51  ;;  %v1187_v63 = vsub.f32 1.0, %v1131_v58 }
 0x28a   :  { %v1133_v0 = vsel %vm1077_vm13, 0.0, %v1800_v34  ;;  %vm1078_vm14 = vcmp.lt.f32.partialorder %v1022_v59, 0.5  ;;  %v912_v1 = vmax.f32 %v840_v15, 0.0  ;;  %v842_v2 = vpop.f32.mrb[46].mxu1  ;;  %v1188_v8 = vsub.f32 1.0, %v1132_v61 }
 0x28b   :  { %v1189_v3 = vsub.f32 1.0, %v1133_v0  ;;  %v1134_v4 = vsel %vm1078_vm14, 0.0, %v1800_v34  ;;  %v967_v5 = vmin.f32 %v911_v62, 1.0  ;;  %v913_v6 = vmax.f32 %v842_v2, 0.0  ;;  %v844_v7 = vpop.f32.mrb[47].mxu1 }
 0x28c   :  { %v1190_v9 = vsub.f32 1.0, %v1134_v4  ;;  %v968_v10 = vmin.f32 %v912_v1, 1.0  ;;  %v914_v11 = vmax.f32 %v844_v7, 0.0 }
 0x28d   :  { %v1223_v13 = vpack.c.bf16 %v1189_v3, %v1187_v63  ;;  %v1023_v14 = vsub.f32 1.0, %v967_v5  ;;  %v969_v16 = vmin.f32 %v913_v6, 1.0 }
 0x28e   :  { %v1024_v17 = vsub.f32 1.0, %v968_v10  ;;  %v970_v18 = vmin.f32 %v914_v11, 1.0  ;;  %v1224_v19 = vpack.c.bf16 %v1190_v9, %v1188_v8 }
 0x28f   :  { %vm1079_vm15 = vcmp.lt.f32.partialorder %v1023_v14, 0.5  ;;  %v1025_v20 = vsub.f32 1.0, %v969_v16 }
 0x290   :  { %v1135_v21 = vsel %vm1079_vm15, 0.0, %v1800_v34  ;;  %vm1080_vm1 = vcmp.lt.f32.partialorder %v1024_v17, 0.5  ;;  %v1026_v22 = vsub.f32 1.0, %v970_v18  ;;  %v848_v23 = vpop.f32.mrb[48].mxu1  ;;  %1261 = vmatprep.subr.bf16.mxu0 %v1224_v19 }
 0x291   :  { %v1136_v24 = vsel %vm1080_vm1, 0.0, %v1800_v34  ;;  %vm1081_vm2 = vcmp.lt.f32.partialorder %v1025_v20, 0.5  ;;  %v915_v25 = vmax.f32 %v848_v23, 0.0  ;;  %v850_v26 = vpop.f32.mrb[49].mxu1  ;;  %1262 = vmatpush1.bf16.msra.mxu0 %v1223_v13  ;;  %v1191_v27 = vsub.f32 1.0, %v1135_v21  ;;  %v1672_v23 = vld [vmem:[#allocation8 + $0x68] sm:$0xff]  }
 0x292   :  { %v1137_v28 = vsel %vm1081_vm2, 0.0, %v1800_v34  ;;  %vm1082_vm3 = vcmp.lt.f32.partialorder %v1026_v22, 0.5  ;;  %v916_v29 = vmax.f32 %v850_v26, 0.0  ;;  %v852_v30 = vpop.f32.mrb[50].mxu1  ;;  %v1192_v37 = vsub.f32 1.0, %v1136_v24  ;;  %1426 = vmatpush1.bf16.msra.mxu1 %v1672_v23 }
 0x293   :  { %v1193_v31 = vsub.f32 1.0, %v1137_v28  ;;  %v1138_v32 = vsel %vm1082_vm3, 0.0, %v1800_v34  ;;  %v971_v33 = vmin.f32 %v915_v25, 1.0  ;;  %v917_v35 = vmax.f32 %v852_v30, 0.0  ;;  %v854_v36 = vpop.f32.mrb[51].mxu1 }
 0x294   :  { %v1194_v38 = vsub.f32 1.0, %v1138_v32  ;;  %v972_v39 = vmin.f32 %v916_v29, 1.0  ;;  %v918_v40 = vmax.f32 %v854_v36, 0.0  ;;  %v1544_v22 = vcombine.low %v1949_v12, %v1949_v12 }
 0x295   :  { %v1225_v41 = vpack.c.bf16 %v1193_v31, %v1191_v27  ;;  %v1027_v42 = vsub.f32 1.0, %v971_v33  ;;  %v973_v43 = vmin.f32 %v917_v35, 1.0 }
 0x296   :  { %v1028_v44 = vsub.f32 1.0, %v972_v39  ;;  %v974_v45 = vmin.f32 %v918_v40, 1.0  ;;  %v1226_v46 = vpack.c.bf16 %v1194_v38, %v1192_v37 }
 0x297   :  { %vm1083_vm4 = vcmp.lt.f32.partialorder %v1027_v42, 0.5  ;;  %v1029_v47 = vsub.f32 1.0, %v973_v43 }
 0x298   :  { %v1139_v48 = vsel %vm1083_vm4, 0.0, %v1800_v34  ;;  %vm1084_vm5 = vcmp.lt.f32.partialorder %v1028_v44, 0.5  ;;  %v1030_v49 = vsub.f32 1.0, %v974_v45  ;;  %v858_v50 = vpop.f32.mrb[52].mxu1  ;;  %1263 = vmatprep.subr.bf16.mxu0 %v1226_v46 }
 0x299   :  { %v1140_v51 = vsel %vm1084_vm5, 0.0, %v1800_v34  ;;  %vm1085_vm6 = vcmp.lt.f32.partialorder %v1029_v47, 0.5  ;;  %v919_v52 = vmax.f32 %v858_v50, 0.0  ;;  %v860_v53 = vpop.f32.mrb[53].mxu1  ;;  %1264 = vmatpush1.bf16.msra.mxu0 %v1225_v41  ;;  %v1195_v54 = vsub.f32 1.0, %v1139_v48 }
 0x29a   :  { %v1141_v55 = vsel %vm1085_vm6, 0.0, %v1800_v34  ;;  %vm1086_vm7 = vcmp.lt.f32.partialorder %v1030_v49, 0.5  ;;  %v920_v56 = vmax.f32 %v860_v53, 0.0  ;;  %v862_v57 = vpop.f32.mrb[54].mxu1  ;;  %v1196_v15 = vsub.f32 1.0, %v1140_v51 }
 0x29b   :  { %v1197_v58 = vsub.f32 1.0, %v1141_v55  ;;  %v1142_v59 = vsel %vm1086_vm7, 0.0, %v1800_v34  ;;  %v975_v60 = vmin.f32 %v919_v52, 1.0  ;;  %v921_v61 = vmax.f32 %v862_v57, 0.0  ;;  %v864_v62 = vpop.f32.mrb[55].mxu1 }
 0x29c   :  { %v1198_v63 = vsub.f32 1.0, %v1142_v59  ;;  %v976_v0 = vmin.f32 %v920_v56, 1.0  ;;  %v922_v1 = vmax.f32 %v864_v62, 0.0 }
 0x29d   :  { %v1227_v2 = vpack.c.bf16 %v1197_v58, %v1195_v54  ;;  %v1031_v3 = vsub.f32 1.0, %v975_v60  ;;  %v977_v4 = vmin.f32 %v921_v61, 1.0 }
 0x29e   :  { %v1032_v5 = vsub.f32 1.0, %v976_v0  ;;  %v978_v6 = vmin.f32 %v922_v1, 1.0  ;;  %v1228_v7 = vpack.c.bf16 %v1198_v63, %v1196_v15 }
 0x29f   :  { %vm1087_vm8 = vcmp.lt.f32.partialorder %v1031_v3, 0.5  ;;  %v1033_v8 = vsub.f32 1.0, %v977_v4 }
 0x2a0   :  { %v1143_v9 = vsel %vm1087_vm8, 0.0, %v1800_v34  ;;  %vm1088_vm9 = vcmp.lt.f32.partialorder %v1032_v5, 0.5  ;;  %v1034_v10 = vsub.f32 1.0, %v978_v6  ;;  %1265 = vmatprep.subr.bf16.mxu0 %v1228_v7 }
 0x2a1   :  { %v1144_v11 = vsel %vm1088_vm9, 0.0, %v1800_v34  ;;  %vm1089_vm10 = vcmp.lt.f32.partialorder %v1033_v8, 0.5  ;;  %1266 = vmatpush1.bf16.msra.mxu0 %v1227_v2  ;;  %v1199_v14 = vsub.f32 1.0, %v1143_v9 }
 0x2a2   :  { %v1145_v13 = vsel %vm1089_vm10, 0.0, %v1800_v34  ;;  %vm1090_vm11 = vcmp.lt.f32.partialorder %v1034_v10, 0.5  ;;  %v1200_v18 = vsub.f32 1.0, %v1144_v11 }
 0x2a3   :  { %v1201_v16 = vsub.f32 1.0, %v1145_v13  ;;  %v1146_v17 = vsel %vm1090_vm11, 0.0, %v1800_v34 }
 0x2a4   :  { %v1202_v19 = vsub.f32 1.0, %v1146_v17 }
 0x2a5   :  { %v1229_v20 = vpack.c.bf16 %v1201_v16, %v1199_v14 }
 0x2a6   :  { %v1230_v21 = vpack.c.bf16 %v1202_v19, %v1200_v18 }
 0x2a8   :  { %1267 = vmatprep.subr.bf16.mxu0 %v1230_v21 }
 0x2a9   :  { %1268 = vmatpush1.bf16.msra.mxu0 %v1229_v20 }
 0x2ac   :  { %1274 = vmatmul.mubr.bf16.vlgmr.msra.gmra.mrb[56].mxu0 %v1544_v22 }
 0x37f   :  { %v1275_v24 = vpop.f32.mrb[56].mxu0 }
 0x380   :  { %v1277_v25 = vpop.f32.mrb[57].mxu0  ;;  %v1282_v28 = vpack.c.bf16 %v1275_v24, %v1275_v24 }
 0x381   :  { %v1283_v26 = vpack.c.bf16 %v1277_v25, %v1277_v25  ;;  %v1279_v27 = vpop.f32.mrb[58].mxu0 }
 0x382   :  { %v1280_v29 = vpop.f32.mrb[59].mxu0 }
 0x383   :  { %1561 = vmatprep.mubr.msk.bf16.mxu1 %vm394_vm0, %v1283_v26 }
 0x384   :  { %1432 = vmatmul.mubr.bf16.vlgmr.msra.gmra.mrb[56].mxu1 %v1282_v28 }
 0x457   :  { %v1433_v30 = vpop.f32.mrb[56].mxu1 }
 0x458   :  { %v1439_v31 = vmul.f32 0.0009765625, %v1433_v30  ;;  %v1435_v32 = vpop.f32.mrb[57].mxu1 }
 0x459   :  { %v1436_v33 = vpop.f32.mrb[58].mxu1 }
 0x45a   :  { %vm1440_vm12 = vcmp.gt.f32.partialorder %v1439_v31, 0.2  ;;  %v1437_v12 = vpop.f32.mrb[59].mxu1 }
 0x45b   :  { %v1441_v35 = vsel %vm1440_vm12, 0.0, %v1800_v34 }
 0x45c   :  { %1442 = vst [vmem:[#allocation10] sm:$0xff] %v1441_v35 }
 0x45d   :  { %1772 = shalt.err (!%p1769_p8)
}
 0x45e   :  { %s1773_s15 = scalar_lea.hbm %s2044_s4, 128 }
 0x45f   :  { %p1774_p9 = scmp.ne.s32.totalorder %s2044_s4, %s1773_s15  ;;  %p1777_p10 = scmp.lt.u32.totalorder %s1773_s15, %s2044_s4 }
 0x461   :  { %p1779_p11 = pnand %p1777_p10, %p1774_p9 }
 0x463   :  { %1782 = shalt.err (!%p1779_p11)
}
 0x464   :  { %1452 = dma.vmem_to_hbm [thread:$0]  %s1450_s12, 128, %s2044_s4, [#allocation4]  }
 0x465   :  { %1789 = dma.done.wait [#allocation4], 128  }
 0x466   :  { %1790 = vsyncadd [#allocation4], 4294967168 }
 0x467   :  { %1456 = vsyncpa [#allocation3], 1 }
 0x468   :  { %1457 = vsyncpa [#allocation6], 1 }
 0x469   :  { %1458 = vsyncpa [#allocation9], 1 }
 0x46a   :  { %1459 = vsyncpa [#allocation4], 1 }

</bundles_post_ra>
